<compile_context>
chip_gen: v7x
topology: tpu7x:2x2x1
jax: 0.10.0
libtpu: 0.0.40
codegen_flags: <defaults>
</compile_context>

<pallas_src>
import functools

import jax
import jax.numpy as jnp
from jax.experimental import pallas as pl
from jax.experimental.pallas import tpu as pltpu


def _ffn_kernel_fused(x1_ref, x2_ref, w1_ref, b1_ref, w2_ref, b2_ref, out_ref, xcat_ref):
    """v6e/v7x path: one K=2d dot for fc_1 (fills the 256-deep MXU contraction)."""
    d = x1_ref.shape[1]
    # Build the (TB, 2d) bf16 operand with two lane-aligned stores (no XLU concat).
    xcat_ref[:, :d] = x1_ref[...].astype(jnp.bfloat16)
    xcat_ref[:, d:] = x2_ref[...].astype(jnp.bfloat16)
    h = jnp.dot(xcat_ref[...], w1_ref[...], preferred_element_type=jnp.float32)
    h = jnp.maximum(h + b1_ref[...], 0.0)  # ReLU
    # Dropout(p=0.25) is identity at inference time (eval-mode semantics).
    # TODO(synk): training-mode dropout (pltpu.prng_seed + stateful_bernoulli) not implemented.
    y = jnp.dot(h.astype(jnp.bfloat16), w2_ref[...], preferred_element_type=jnp.float32)
    out_ref[...] = (y + b2_ref[...]).astype(out_ref.dtype)


def _ffn_kernel_split(x1_ref, x2_ref, w1a_ref, w1b_ref, b1_ref, w2_ref, b2_ref, out_ref):
    """v5e path: MXU contracts 128 deep, so two K=d dots already saturate it (no scratch copy)."""
    h = jnp.dot(x1_ref[...].astype(jnp.bfloat16), w1a_ref[...],
                preferred_element_type=jnp.float32)
    h = h + jnp.dot(x2_ref[...].astype(jnp.bfloat16), w1b_ref[...],
                    preferred_element_type=jnp.float32)
    h = jnp.maximum(h + b1_ref[...], 0.0)  # ReLU
    # Dropout identity at inference (see fused kernel TODO).
    y = jnp.dot(h.astype(jnp.bfloat16), w2_ref[...], preferred_element_type=jnp.float32)
    out_ref[...] = (y + b2_ref[...]).astype(out_ref.dtype)


def _round_up(x, m):
    return ((x + m - 1) // m) * m


def _choose_tb(batch):
    # Biggest tile that still leaves >= 2 grid steps (v7x: 2 TensorCores on the
    # "parallel" batch axis), capped at 512; 16-multiple keeps bf16 sublane packing clean.
    return max(16, min(512, _round_up(pl.cdiv(batch, 2), 16)))


def should_fuse_fc1():
    """Fused K=2d fc_1 on v6e/v7x; split two-dot form on v5e and older (128-deep MXU)."""
    try:
        kind = jax.devices()[0].device_kind.lower()
    except Exception:
        return True
    return not any(v in kind for v in ("v2", "v3", "v4", "v5"))


def make_params(key, d):
    """f32 master params, PyTorch nn.Linear-style init U(-1/sqrt(fan_in), +1/sqrt(fan_in))."""
    def linear(k, fan_in, fan_out):
        kw, kb = jax.random.split(k)
        bound = 1.0 / (fan_in ** 0.5)
        w = jax.random.uniform(kw, (fan_in, fan_out), jnp.float32, -bound, bound)
        b = jax.random.uniform(kb, (1, fan_out), jnp.float32, -bound, bound)
        return w, b

    k1, k2 = jax.random.split(key)
    w1, b1 = linear(k1, 2 * d, 4 * d)   # fc_1: 2d -> 4d
    w2, b2 = linear(k2, 4 * d, d)       # fc_2: 4d -> d
    return w1, b1, w2, b2


def prepare_params(params, d, *, fuse_fc1):
    """One-time host-side prep: cast weights to bf16; split fc_1 weight only on v5e."""
    w1, b1, w2, b2 = params
    if fuse_fc1:
        return (w1.astype(jnp.bfloat16), b1, w2.astype(jnp.bfloat16), b2)
    return (w1[:d].astype(jnp.bfloat16),   # W1a: multiplies x_1
            w1[d:].astype(jnp.bfloat16),   # W1b: multiplies x_2
            b1,
            w2.astype(jnp.bfloat16),
            b2)


def ffn_forward(x1, x2, prepped, *, fuse_fc1=True, tb=None, out_dtype=jnp.float32):
    """Batched FFN forward.  No host-side padding: Pallas masks the ragged last block."""
    B, d = x1.shape
    assert x2.shape == (B, d)
    if tb is None:
        tb = _choose_tb(B)

    grid = (pl.cdiv(B, tb),)
    act_spec = pl.BlockSpec((tb, d), lambda i: (i, 0))
    out_spec = pl.BlockSpec((tb, d), lambda i: (i, 0))
    out_shape = jax.ShapeDtypeStruct((B, d), out_dtype)
    cparams = pltpu.CompilerParams(dimension_semantics=("parallel",))

    def resident(shape):
        # Constant block index + single pipeline buffer -> weight/bias stays
        # VMEM-resident across steps with no wasted second buffer.
        return pl.BlockSpec(shape, lambda i: (0, 0), pipeline_mode=pl.Buffered(1))

    if fuse_fc1:
        w1, b1, w2, b2 = prepped
        d2, d4 = w1.shape
        return pl.pallas_call(
            _ffn_kernel_fused,
            out_shape=out_shape,
            grid=grid,
            in_specs=[
                act_spec,                 # x1
                act_spec,                 # x2
                resident((d2, d4)),       # W1 (unsplit, 2d x 4d)
                resident((1, d4)),        # b1
                resident((d4, d)),        # W2
                resident((1, d)),         # b2
            ],
            out_specs=out_spec,
            scratch_shapes=[pltpu.VMEM((tb, d2), jnp.bfloat16)],  # (TB, 2d) concat buffer
            compiler_params=cparams,
        )(x1, x2, w1, b1, w2, b2)

    w1a, w1b, b1, w2, b2 = prepped
    d4 = w1a.shape[1]
    return pl.pallas_call(
        _ffn_kernel_split,
        out_shape=out_shape,
        grid=grid,
        in_specs=[
            act_spec,                 # x1
            act_spec,                 # x2
            resident((d, d4)),        # W1a
            resident((d, d4)),        # W1b
            resident((1, d4)),        # b1
            resident((d4, d)),        # W2
            resident((1, d)),         # b2
        ],
        out_specs=out_spec,
        compiler_params=cparams,
    )(x1, x2, w1a, w1b, b1, w2, b2)


if __name__ == "__main__":
    key = jax.random.PRNGKey(0)
    kp, kx1, kx2 = jax.random.split(key, 3)

    D = 128   # model dim d (lane-aligned)
    B = 200   # deliberately not a tile multiple -> exercises the ragged last block

    fuse = should_fuse_fc1()
    params = make_params(kp, D)
    prepped = prepare_params(params, D, fuse_fc1=fuse)

    x1 = jax.random.normal(kx1, (B, D), jnp.float32)
    x2 = jax.random.normal(kx2, (B, D), jnp.float32)

    fwd = jax.jit(functools.partial(ffn_forward, fuse_fc1=fuse))
    out = jax.block_until_ready(fwd(x1, x2, prepped))

    # Pure-JAX reference mimicking the kernel's bf16 storage with f32 accumulation.
    w1, b1, w2, b2 = params
    bf = lambda a: a.astype(jnp.bfloat16).astype(jnp.float32)
    x_cat = jnp.concatenate([bf(x1), bf(x2)], axis=1)
    h_ref = jnp.maximum(x_cat @ bf(w1) + b1, 0.0)
    ref = bf(h_ref) @ bf(w2) + b2

    assert out.shape == (B, D)
    assert bool(jnp.all(jnp.isfinite(out)))
    assert jnp.allclose(out, ref, atol=3e-2, rtol=3e-2)

    print("KERNEL_OK")
</pallas_src>

<mosaic_0001>
module attributes {stable_mosaic.version = 11 : i64} {
  func.func @_ffn_kernel_fused(%arg0: i32, %arg1: memref<112x128xf32, #tpu.memory_space<vmem>>, %arg2: memref<112x128xf32, #tpu.memory_space<vmem>>, %arg3: memref<256x512xbf16, #tpu.memory_space<vmem>>, %arg4: memref<1x512xf32, #tpu.memory_space<vmem>>, %arg5: memref<512x128xbf16, #tpu.memory_space<vmem>>, %arg6: memref<1x128xf32, #tpu.memory_space<vmem>>, %arg7: memref<112x128xf32, #tpu.memory_space<vmem>>, %arg8: memref<112x256xbf16, #tpu.memory_space<vmem>>) attributes {dimension_semantics = [#tpu.dimension_semantics<parallel>], iteration_bounds = array<i64: 2>, scalar_prefetch = 0 : i64, scratch_operands = 1 : i64, tpu.core_type = #tpu.core_type<tc>, window_params = [{transform_indices = @transform_0, window_bounds = array<i64: 112, 128>}, {transform_indices = @transform_1, window_bounds = array<i64: 112, 128>}, {pipeline_mode = #tpu.pipeline_mode<synchronous>, transform_indices = @transform_2, window_bounds = array<i64: 256, 512>}, {pipeline_mode = #tpu.pipeline_mode<synchronous>, transform_indices = @transform_3, window_bounds = array<i64: 1, 512>}, {pipeline_mode = #tpu.pipeline_mode<synchronous>, transform_indices = @transform_4, window_bounds = array<i64: 512, 128>}, {pipeline_mode = #tpu.pipeline_mode<synchronous>, transform_indices = @transform_5, window_bounds = array<i64: 1, 128>}, {transform_indices = @transform_6, window_bounds = array<i64: 112, 128>}]} {
    %c0 = arith.constant 0 : index
    %c0_0 = arith.constant 0 : index
    %0 = vector.load %arg1[%c0, %c0_0] : memref<112x128xf32, #tpu.memory_space<vmem>>, vector<112x128xf32>
    %1 = arith.truncf %0 : vector<112x128xf32> to vector<112x128xbf16>
    %c0_1 = arith.constant 0 : index
    %c0_2 = arith.constant 0 : index
    %2 = vector.load %arg8[%c0_1, %c0_2] : memref<112x256xbf16, #tpu.memory_space<vmem>>, vector<112x128xbf16>
    tpu.vector_store %arg8[%c0_1, %c0_2], %1 {strides = array<i32>} : memref<112x256xbf16, #tpu.memory_space<vmem>>, vector<112x128xbf16>,
    %c0_3 = arith.constant 0 : index
    %c0_4 = arith.constant 0 : index
    %3 = vector.load %arg2[%c0_3, %c0_4] : memref<112x128xf32, #tpu.memory_space<vmem>>, vector<112x128xf32>
    %4 = arith.truncf %3 : vector<112x128xf32> to vector<112x128xbf16>
    %c0_5 = arith.constant 0 : index
    %c128 = arith.constant 128 : index
    %5 = vector.load %arg8[%c0_5, %c128] : memref<112x256xbf16, #tpu.memory_space<vmem>>, vector<112x128xbf16>
    tpu.vector_store %arg8[%c0_5, %c128], %4 {strides = array<i32>} : memref<112x256xbf16, #tpu.memory_space<vmem>>, vector<112x128xbf16>,
    %c0_6 = arith.constant 0 : index
    %c0_7 = arith.constant 0 : index
    %6 = vector.load %arg8[%c0_6, %c0_7] : memref<112x256xbf16, #tpu.memory_space<vmem>>, vector<112x256xbf16>
    %c0_8 = arith.constant 0 : index
    %c0_9 = arith.constant 0 : index
    %7 = vector.load %arg3[%c0_8, %c0_9] : memref<256x512xbf16, #tpu.memory_space<vmem>>, vector<256x512xbf16>
    %cst = arith.constant dense<0.000000e+00> : vector<112x512xf32>
    %8 = tpu.matmul %6, %7, %cst {dimension_numbers = #tpu.dot_dimension_numbers<[1], [0], [0], [1], [0, 0, 1, 1], [], []>} : vector<112x256xbf16>, vector<256x512xbf16>, vector<112x512xf32> -> vector<112x512xf32>
    %c0_10 = arith.constant 0 : index
    %c0_11 = arith.constant 0 : index
    %9 = vector.load %arg4[%c0_10, %c0_11] : memref<1x512xf32, #tpu.memory_space<vmem>>, vector<1x512xf32>
    %10 = vector.broadcast %9 : vector<1x512xf32> to vector<112x512xf32>
    %11 = arith.addf %8, %10 : vector<112x512xf32>
    %cst_12 = arith.constant 0.000000e+00 : f32
    %12 = vector.broadcast %cst_12 : f32 to vector<112x512xf32>
    %13 = arith.maximumf %11, %12 : vector<112x512xf32>
    %14 = arith.truncf %13 : vector<112x512xf32> to vector<112x512xbf16>
    %c0_13 = arith.constant 0 : index
    %c0_14 = arith.constant 0 : index
    %15 = vector.load %arg5[%c0_13, %c0_14] : memref<512x128xbf16, #tpu.memory_space<vmem>>, vector<512x128xbf16>
    %cst_15 = arith.constant dense<0.000000e+00> : vector<112x128xf32>
    %16 = tpu.matmul %14, %15, %cst_15 {dimension_numbers = #tpu.dot_dimension_numbers<[1], [0], [0], [1], [0, 0, 1, 1], [], []>} : vector<112x512xbf16>, vector<512x128xbf16>, vector<112x128xf32> -> vector<112x128xf32>
    %c0_16 = arith.constant 0 : index
    %c0_17 = arith.constant 0 : index
    %17 = vector.load %arg6[%c0_16, %c0_17] : memref<1x128xf32, #tpu.memory_space<vmem>>, vector<1x128xf32>
    %18 = vector.broadcast %17 : vector<1x128xf32> to vector<112x128xf32>
    %19 = arith.addf %16, %18 : vector<112x128xf32>
    %c0_18 = arith.constant 0 : index
    %c0_19 = arith.constant 0 : index
    %20 = vector.load %arg7[%c0_18, %c0_19] : memref<112x128xf32, #tpu.memory_space<vmem>>, vector<112x128xf32>
    tpu.vector_store %arg7[%c0_18, %c0_19], %19 {strides = array<i32>} : memref<112x128xf32, #tpu.memory_space<vmem>>, vector<112x128xf32>,
    return
  }
  func.func @transform_0(%arg0: i32) -> (i32, i32) {
    %c0_i32 = arith.constant 0 : i32
    %c0_i32_0 = arith.constant 0 : i32
    return %arg0, %c0_i32 : i32, i32
  }
  func.func @transform_1(%arg0: i32) -> (i32, i32) {
    %c0_i32 = arith.constant 0 : i32
    %c0_i32_0 = arith.constant 0 : i32
    return %arg0, %c0_i32 : i32, i32
  }
  func.func @transform_2(%arg0: i32) -> (i32, i32) {
    %c0_i32 = arith.constant 0 : i32
    %c0_i32_0 = arith.constant 0 : i32
    %c0_i32_1 = arith.constant 0 : i32
    return %c0_i32, %c0_i32_0 : i32, i32
  }
  func.func @transform_3(%arg0: i32) -> (i32, i32) {
    %c0_i32 = arith.constant 0 : i32
    %c0_i32_0 = arith.constant 0 : i32
    %c0_i32_1 = arith.constant 0 : i32
    return %c0_i32, %c0_i32_0 : i32, i32
  }
  func.func @transform_4(%arg0: i32) -> (i32, i32) {
    %c0_i32 = arith.constant 0 : i32
    %c0_i32_0 = arith.constant 0 : i32
    %c0_i32_1 = arith.constant 0 : i32
    return %c0_i32, %c0_i32_0 : i32, i32
  }
  func.func @transform_5(%arg0: i32) -> (i32, i32) {
    %c0_i32 = arith.constant 0 : i32
    %c0_i32_0 = arith.constant 0 : i32
    %c0_i32_1 = arith.constant 0 : i32
    return %c0_i32, %c0_i32_0 : i32, i32
  }
  func.func @transform_6(%arg0: i32) -> (i32, i32) {
    %c0_i32 = arith.constant 0 : i32
    %c0_i32_0 = arith.constant 0 : i32
    return %arg0, %c0_i32 : i32, i32
  }
}

</mosaic_0001>

<bundles_post_ra>
// kernel: ffn_forward.1
= control target key start
LH: loop header
LB: loop body
LE: loop exit
PB: predicated region body
PF: predicated region fallthrough
CT: control target
= control target key end

     0   :  { %11 = vsyncpa [#allocation4], 0  ;;  %s2847_s0 = inlined_call_operand.hbm [shape: f32[200,128], index: 0, kind: input, shape index: {}]   ;;  %s2848_s1 = inlined_call_operand.hbm [shape: f32[200,128], index: 1, kind: input, shape index: {}]   ;;  %s2849_s2 = inlined_call_operand.hbm [shape: bf16[256,512], index: 2, kind: input, shape index: {}]   ;;  %s2850_s3 = inlined_call_operand.vmem [shape: f32[1,512], index: 3, kind: input, shape index: {}]   ;;  %s2851_s4 = inlined_call_operand.hbm [shape: bf16[512,128], index: 4, kind: input, shape index: {}]   ;;  %s2852_s5 = inlined_call_operand.vmem [shape: f32[1,128], index: 5, kind: input, shape index: {}]   ;;  %s2853_s6 = inlined_call_operand.hbm [shape: f32[200,128], index: 6, kind: output, shape index: {}]  }
   0x1   :  { %13 = vsyncpa [#allocation4 + $0x1], 0 }
   0x2   :  { %14 = vsyncpa [#allocation7], 0 }
   0x3   :  { %16 = vsyncpa [#allocation7 + $0x1], 0 }
   0x4   :  { %17 = vsyncpa [#allocation10], 0 }
   0x5   :  { %18 = vsyncpa [#allocation5], 0 }
   0x6   :  { %20 = vsyncpa [#allocation5 + $0x1], 0  ;;  %s2408_s21 = smov 0   ;;  %s2410_s22 = smov 0  }
   0x7   :  { %s2412_s23 = smov 0   ;;  %s2414_s24 = smov 0  }
   0x8 LB: > { %s2429_s25 = sadd.s32 4294967295, %s2356_s24   ;;  %s1723_s26 = sadd.s32 4294967294, %s2356_s24   ;;  %s2356_s24 = sphi %s2414_s24, %s2877_s24   ;;  %s2352_s23 = sphi %s2412_s23, %s2881_s23   ;;  %s2348_s22 = sphi %s2410_s22, %s2880_s22   ;;  %s2344_s21 = sphi %s2408_s21, %s2879_s21  }
   0x9   : > { %s2433_s27 = sadd.s32 1, %s2356_s24   ;;  %s33_s28 = sadd.s32 1, %s2352_s23 }
   0xa   : > { %2859 = sst [smem:[#allocation17_spill]] %s2433_s27  ;;  %s30_s29 = ssub.s32 %s2356_s24, %s2433_s27 }
   0xb   : > { %p40_p0 = scmp.ne.s32.totalorder %s2352_s23, %s2348_s22  ;;  %p31_p1 = scmp.eq.s32.totalorder %s30_s29, 0 }
   0xc   : > { %p41_p2 = scmp.eq.s32.totalorder %s2356_s24, 0  ;;  %p46_p3 = scmp.ne.s32.totalorder %s2348_s22, %s2344_s21 }
   0xd   : > { %p2854_p4 = scmp.eq.s32.totalorder %s2429_s25, 0  ;;  %p180_p7 = scmp.eq.s32.totalorder %s2429_s25, 1 }
   0xe   : > { %s2445_s30 = scalar_select %p31_p1, %s2352_s23, %s33_s28  }
   0xf   : > { %p2447_p5 = por %p41_p2, %p40_p0  ;;  %p2453_p6 = por %p2854_p4, %p46_p3 }
  0x10   : > { %2860 = sst [smem:[#allocation18_spill]] %s2445_s30  ;;  %p186_p8 = scmp.eq.s32.totalorder %s1723_s26, 1 }
  0x11   : > { %s2861_s7 = scalar_select %p2447_p5, 1, 0 }
  0x12   : > { %s2862_s8 = scalar_select %p2453_p6, 1, 0 }
  0x13   : > { %p1724_p9 = scmp.ge.s32.totalorder %s2356_s24, 1  ;;  %p193_p10 = scmp.lt.s32.totalorder %s2356_s24, 3 }
  0x14   : > { %p2460_p11 = por %p180_p7, %p40_p0  ;;  %p2464_p12 = por %p186_p8, %p46_p3 }
  0x15   : > { %p2468_p13 = pnand %p1724_p9, %p193_p10  ;;  %s2358_s12 = smov [#allocation8]  }
  0x16   : > { %s2863_s9 = scalar_select %p2460_p11, 1, 0 }
  0x17   : > { %s2864_s10 = scalar_select %p2464_p12, 1, 0 }
  0x18   : > { %s2865_s11 = scalar_select %p2468_p13, 1, 0 }
  0x19   : > { %p1978_p1 = pneg %p2468_p13  ;;  %s205_s13 = sshll.u32 %s2358_s12, 4  ;;  %s206_s13 = int_to_ptr.vmem [resolvable:$true] %s205_s13 }
  0x1a   : > { %s2359_s15 = smov [#allocation9]   ;;  %s2166_s19 = scalar_lea.hbm %s2849_s2, 8192 }
  0x1b   : > { %p2476_p2 = pnand %p1978_p1, %p2854_p4  ;;  %s221_s16 = sshll.u32 %s2359_s15, 4  ;;  %s2480_s16 = int_to_ptr.vmem [resolvable:$true] %s221_s16 }
  0x1c   : > { %p2167_p0 = scmp.ne.s32.totalorder %s2849_s2, %s2166_s19  ;;  %p2173_p9 = scmp.lt.u32.totalorder %s2166_s19, %s2849_s2 }
  0x1d   : > { %p2168_p3 = pneg %p2476_p2 }
  0x1f   : > { %p2169_p7 = pnand %p2168_p3, %p2167_p0 }
  0x21   : > { %p2170_p8 = pneg %p2169_p7 }
  0x23   : > { %p2175_p10 = pnand %p2173_p9, %p2170_p8 }
  0x25   : > { %2178 = shalt.err (!%p2175_p10)
}
  0x26   : > { %s2179_s12 = scalar_lea.vmem %s206_s13, 8192  ;;  %p2187_p11 = scmp.lt.s32.totalorder %s206_s13, %s206_s13 }
  0x27   : > { %p2180_p1 = scmp.ne.s32.totalorder %s206_s13, %s2179_s12  ;;  %p2188_p6 = scmp.lt.s32.totalorder %s2179_s12, %s2179_s12 }
  0x29   : > { %p2182_p4 = pnand %p2180_p1, %p2168_p3  ;;  %p2189_p13 = por %p2188_p6, %p2187_p11 }
  0x2b   : > { %p2183_p12 = pneg %p2182_p4 }
  0x2d   : > { %p2190_p5 = pnand %p2189_p13, %p2183_p12 }
  0x2f   : > { %2193 = shalt.err (!%p2190_p5)
}
  0x30   : > { %s2360_s15 = smov 256   ;;  %s2361_s17 = smov 16  }
  0x31   : > { %1981 = dma.hbm_to_vmem [thread:$0]  (!%p2476_p2), %s2849_s2, 8192, %s206_s13, [#allocation7], %s2360_s15, %s2360_s15, %s2361_s17  }
  0x32   : > { %s2194_s28 = scalar_lea.hbm %s2851_s4, 4096 }
  0x33   : > { %p2195_p4 = scmp.ne.s32.totalorder %s2851_s4, %s2194_s28  ;;  %p2201_p11 = scmp.lt.u32.totalorder %s2194_s28, %s2851_s4 }
  0x35   : > { %p2197_p5 = pnand %p2195_p4, %p2168_p3 }
  0x37   : > { %p2198_p6 = pneg %p2197_p5 }
  0x39   : > { %p2203_p12 = pnand %p2201_p11, %p2198_p6 }
  0x3b   : > { %2206 = shalt.err (!%p2203_p12)
}
  0x3c   : > { %s2207_s13 = scalar_lea.vmem %s2480_s16, 4096  ;;  %p2215_p8 = scmp.lt.s32.totalorder %s2480_s16, %s2480_s16 }
  0x3d   : > { %p2208_p13 = scmp.ne.s32.totalorder %s2480_s16, %s2207_s13  ;;  %p2216_p9 = scmp.lt.s32.totalorder %s2207_s13, %s2207_s13 }
  0x3f   : > { %p2210_p0 = pnand %p2208_p13, %p2168_p3  ;;  %p2217_p10 = por %p2216_p9, %p2215_p8 }
  0x41   : > { %p2211_p7 = pneg %p2210_p0 }
  0x43   : > { %p2218_p1 = pnand %p2217_p10, %p2211_p7 }
  0x45   : > { %2221 = shalt.err (!%p2218_p1)
}
  0x46   : > { %s2362_s27 = smov 64   ;;  %s2363_s30 = smov 4  }
  0x47   : > { %1984 = dma.hbm_to_vmem [thread:$0]  (!%p2476_p2), %s2851_s4, 4096, %s2480_s16, [#allocation10], %s2362_s27, %s2362_s27, %s2363_s30  }
  0x48   : > { %p1727_p4 = scmp.ge.s32.totalorder %s2356_s24, 2 }
  0x49   : > { %p2867_p3 = scmp.ne.s32.totalorder (!%p1727_p4), %s2861_s7, 0 }
  0x4a   : > { %234 = sbr.rel (%p1727_p4) target bundleno = 153 (0x99), region = 32 }
  0x51   : > { %237 = sbr.rel (!%p2867_p3) target bundleno = 116 (0x74), region = 36  ;;  %s238_s18 = sand.u32 (%p2867_p3), 1, %s2352_s23  }
  0x52   : > { %s243_s19 = smul.u32 (%p2867_p3), 14, %s2356_s24  ;;  %s2539_s28 = scalar_lea.sflag (%p2867_p3), [#allocation4], %s238_s18 }
  0x53   : > { %s1964_s20 = smul.u32 (%p2867_p3), 112, %s238_s18 }
  0x54   : > { %s244_s26 = ssub.s32 (%p2867_p3), 25, %s243_s19 }
  0x55   : > { %p245_p5 = scmp.lt.s32.totalorder (%p2867_p3), %s244_s26, 14  ;;  %s242_s29 = scalar_lea.vmem (%p2867_p3), [#allocation3], %s1964_s20 }
  0x58   : > { %s2883_s26 = smov (!%p245_p5, %s244_s26), 14 }
  0x59   : > { %s2536_s14 = sshll.u32 %s2883_s26, 7 }
  0x5a   : > { %s249_s16 = ssub.s32 1792, %s2536_s14 }
  0x5b   : > { %250 = vsyncadd %s2539_s28, %s249_s16  ;;  %p1729_p2 = scmp.ne.s32.totalorder %s2536_s14, 0  ;;  %s1845_s12 = smul.u32 1792, %s2356_s24 }
  0x5c   : > { %s255_s13 = sshll.u32 %s242_s29, 4  ;;  %s2226_s20 = scalar_lea.hbm %s2847_s0, 3200  ;;  %s2549_s13 = int_to_ptr.vmem [resolvable:$true] %s255_s13 }
  0x5d   : > { %s2547_s15 = scalar_lea.hbm %s2847_s0, %s1845_s12 }
  0x5e   : > { %s2222_s17 = scalar_lea.hbm %s2547_s15, %s2536_s14  ;;  %p2227_p13 = scmp.lt.u32.totalorder %s2547_s15, %s2847_s0 }
  0x5f   : > { %p2223_p6 = scmp.ne.s32.totalorder %s2547_s15, %s2222_s17  ;;  %p2228_p0 = scmp.lt.u32.totalorder %s2226_s20, %s2222_s17 }
  0x60   : > { %p2230_p8 = scmp.lt.u32.totalorder %s2222_s17, %s2547_s15 }
  0x61   : > { %p2224_p11 = pnand %p2223_p6, %p1729_p2  ;;  %p2229_p7 = por %p2228_p0, %p2227_p13 }
  0x63   : > { %p2225_p12 = pneg %p2224_p11  ;;  %p2231_p9 = por %p2230_p8, %p2229_p7 }
  0x65   : > { %p2232_p10 = pnand %p2231_p9, %p2225_p12 }
  0x67   : > { %2235 = shalt.err (!%p2232_p10)
}
  0x68   : > { %s2236_s29 = scalar_lea.vmem %s2549_s13, %s2536_s14  ;;  %s2364_s12 = smov [#allocation3]  }
  0x69   : > { %p2237_p1 = scmp.ne.s32.totalorder %s2549_s13, %s2236_s29  ;;  %s2240_s27 = sshll.u32 %s2364_s12, 4  ;;  %s2241_s27 = int_to_ptr.vmem [resolvable:$false] %s2240_s27 }
  0x6a   : > { %s2242_s30 = scalar_lea.vmem %s2241_s27, 3584  ;;  %p2243_p6 = scmp.lt.s32.totalorder %s2549_s13, %s2241_s27 }
  0x6b   : > { %p2238_p3 = pnand %p2237_p1, %p1729_p2  ;;  %p2244_p11 = scmp.lt.s32.totalorder %s2242_s30, %s2236_s29 }
  0x6d   : > { %p2239_p5 = pneg %p2238_p3  ;;  %p2245_p13 = por %p2244_p11, %p2243_p6 }
  0x6f   : > { %p2246_p0 = pnand %p2245_p13, %p2239_p5 }
  0x71   : > { %2249 = shalt.err (!%p2246_p0)
}
  0x72   : > { %s2365_s17 = smov 128   ;;  %s2366_s18 = smov 8  }
  0x73   : > { %261 = dma.hbm_to_vmem [thread:$0]  (%p1729_p2), %s2547_s15, %s2536_s14, %s2549_s13, %s2539_s28, %s2365_s17, %s2365_s17, %s2366_s18  }
  0x74 PF: > { %p2868_p12 = scmp.ne.s32.totalorder %s2861_s7, 0 }
  0x75   : > { %s265_s19 = sand.u32 (%p2868_p12), 1, %s2356_s24   ;;  %s267_s20 = sand.u32 (%p2868_p12), 1, %s2352_s23  }
  0x76   : > { %264 = sbr.rel (!%p2868_p12) target bundleno = 153 (0x99), region = 40  ;;  %s2584_s30 = scalar_lea.sflag (%p2868_p12), [#allocation7], %s265_s19 }
  0x77   : > { %s1965_s26 = smul.u32 (%p2868_p12), 112, %s267_s20 }
  0x78   : > { %s270_s16 = smul.u32 (%p2868_p12), 14, %s2356_s24 }
  0x79   : > { %s269_s14 = scalar_lea.vmem (%p2868_p12), [#allocation6], %s1965_s26 }
  0x7a   : > { %s271_s29 = ssub.s32 (%p2868_p12), 25, %s270_s16 }
  0x7b   : > { %p272_p7 = scmp.lt.s32.totalorder (%p2868_p12), %s271_s29, 14 }
  0x7d   : > { %s2885_s29 = smov (!%p272_p7, %s271_s29), 14 }
  0x7e   : > { %s2581_s12 = sshll.u32 %s2885_s29, 7 }
  0x7f   : > { %s276_s27 = ssub.s32 1792, %s2581_s12 }
  0x80   : > { %277 = vsyncadd %s2584_s30, %s276_s27  ;;  %p1734_p2 = scmp.ne.s32.totalorder %s2581_s12, 0  ;;  %s1846_s7 = smul.u32 1792, %s2356_s24 }
  0x81   : > { %s282_s28 = sshll.u32 %s269_s14, 4  ;;  %s2254_s26 = scalar_lea.hbm %s2848_s1, 3200  ;;  %s2594_s28 = int_to_ptr.vmem [resolvable:$true] %s282_s28 }
  0x82   : > { %s2592_s17 = scalar_lea.hbm %s2848_s1, %s1846_s7 }
  0x83   : > { %s2250_s18 = scalar_lea.hbm %s2592_s17, %s2581_s12  ;;  %p2255_p1 = scmp.lt.u32.totalorder %s2592_s17, %s2848_s1 }
  0x84   : > { %p2251_p8 = scmp.ne.s32.totalorder %s2592_s17, %s2250_s18  ;;  %p2256_p3 = scmp.lt.u32.totalorder %s2254_s26, %s2250_s18 }
  0x85   : > { %p2258_p6 = scmp.lt.u32.totalorder %s2250_s18, %s2592_s17 }
  0x86   : > { %p2252_p9 = pnand %p2251_p8, %p1734_p2  ;;  %p2257_p5 = por %p2256_p3, %p2255_p1 }
  0x88   : > { %p2253_p10 = pneg %p2252_p9  ;;  %p2259_p11 = por %p2258_p6, %p2257_p5 }
  0x8a   : > { %p2260_p13 = pnand %p2259_p11, %p2253_p10 }
  0x8c   : > { %2263 = shalt.err (!%p2260_p13)
}
  0x8d   : > { %s2264_s27 = scalar_lea.vmem %s2594_s28, %s2581_s12  ;;  %s2367_s14 = smov [#allocation6]  }
  0x8e   : > { %p2265_p0 = scmp.ne.s32.totalorder %s2594_s28, %s2264_s27  ;;  %s2268_s7 = sshll.u32 %s2367_s14, 4  ;;  %s2269_s7 = int_to_ptr.vmem [resolvable:$false] %s2268_s7 }
  0x8f   : > { %s2270_s13 = scalar_lea.vmem %s2269_s7, 3584  ;;  %p2271_p8 = scmp.lt.s32.totalorder %s2594_s28, %s2269_s7 }
  0x90   : > { %p2266_p12 = pnand %p2265_p0, %p1734_p2  ;;  %p2272_p9 = scmp.lt.s32.totalorder %s2270_s13, %s2264_s27 }
  0x92   : > { %p2267_p7 = pneg %p2266_p12  ;;  %p2273_p1 = por %p2272_p9, %p2271_p8 }
  0x94   : > { %p2274_p3 = pnand %p2273_p1, %p2267_p7 }
  0x96   : > { %2277 = shalt.err (!%p2274_p3)
}
  0x97   : > { %s2368_s15 = smov 128   ;;  %s2369_s18 = smov 8  }
  0x98   : > { %288 = dma.hbm_to_vmem [thread:$0]  (%p1734_p2), %s2592_s17, %s2581_s12, %s2594_s28, %s2584_s30, %s2368_s15, %s2368_s15, %s2369_s18  }
  0x99 PF: > { %p2869_p10 = scmp.ne.s32.totalorder %s2865_s11, 0 }
  0x9a   : > { %s2624_s19 = sand.u32 (!%p2869_p10), 1, %s2348_s22   ;;  %p2870_p5 = scmp.ne.s32.totalorder (!%p2869_p10), %s2862_s8, 0 }
  0x9b   : > { %294 = sbr.rel (%p2869_p10) target bundleno = 757 (0x2f5), region = 44  ;;  %s297_s26 = scalar_lea.sflag (!%p2869_p10), [#allocation4], %s2624_s19 }
  0x9c   : > { %s2627_s20 = smul.u32 (!%p2869_p10), 112, %s2624_s19 }
  0x9e   : > { %s2631_s16 = scalar_lea.vmem (!%p2869_p10), [#allocation3], %s2627_s20 }
  0xa2   : > { %2323 = dma.done.wait (%p2870_p5), %s297_s26, 1792  }
  0xa3   : > { %2325 = vsyncadd (%p2870_p5), %s297_s26, 4294965504  ;;  %s305_s11 = sand.u32 1, %s2429_s25   ;;  %s2639_s30 = scalar_lea.vmem [#allocation6], %s2627_s20 }
  0xa4   : > { %s306_s12 = scalar_lea.sflag [#allocation7], %s305_s11 }
  0xa5   : > { %2327 = dma.done.wait (%p2870_p5), %s306_s12, 1792  }
  0xa6   : > { %2329 = vsyncadd (%p2870_p5), %s306_s12, 4294965504  ;;  %p2871_p2 = scmp.eq.s32.totalorder %s2429_s25, 0 }
  0xa8   : > { %2331 = dma.done.wait (%p2871_p2), [#allocation7], 8192   ;;  %p2872_p6 = pmov %p2871_p2 }
  0xa9   : > { %p2873_p11 = pmov %p2871_p2 }
  0xaa   : > { %2333 = vsyncadd (%p2872_p6), [#allocation7], 4294959104 }
  0xab   : > { %2335 = dma.done.wait (%p2873_p11), [#allocation10], 4096   ;;  %p2874_p13 = pmov %p2871_p2 }
  0xac   : > { %v2038_v0 = vld [vmem:[#allocation8 + $0x4] ss:$16 sps:$4 sm:$0xff]   ;;  %v2040_v1 = vld [vmem:[#allocation8 + $0xc] ss:$16 sps:$4 sm:$0xff]   ;;  %v2042_v2 = vld [vmem:[#allocation8] ss:$16 sps:$4 sm:$0xff]  }
  0xad   : > { %2337 = vsyncadd (%p2874_p13), [#allocation10], 4294963200  ;;  %843 = vmatprep.subr.bf16.mxu0 %v2038_v0  ;;  %v2043_v3 = vld [vmem:[#allocation8 + $0x8] ss:$16 sps:$4 sm:$0xff]   ;;  %946 = vmatprep.subr.bf16.mxu1 %v2040_v1  ;;  %v2044_v4 = vld [vmem:[#allocation8 + $0x24] ss:$16 sps:$4 sm:$0xff]  }
  0xae   : > { %844 = vmatpush1.bf16.msra.mxu0 %v2042_v2  ;;  %947 = vmatpush1.bf16.msra.mxu1 %v2043_v3  ;;  %v2046_v5 = vld [vmem:[#allocation8 + $0x2c] ss:$16 sps:$4 sm:$0xff]   ;;  %v2048_v6 = vld [vmem:[#allocation8 + $0x20] ss:$16 sps:$4 sm:$0xff]   ;;  %v2049_v7 = vld [vmem:[#allocation8 + $0x28] ss:$16 sps:$4 sm:$0xff]  }
  0xaf   : > { %845 = vmatprep.subr.bf16.mxu0 %v2044_v4  ;;  %948 = vmatprep.subr.bf16.mxu1 %v2046_v5  ;;  %v2050_v8 = vld [vmem:[#allocation8 + $0x44] ss:$16 sps:$4 sm:$0xff]   ;;  %v2052_v9 = vld [vmem:[#allocation8 + $0x4c] ss:$16 sps:$4 sm:$0xff]   ;;  %v2054_v10 = vld [vmem:[#allocation8 + $0x40] ss:$16 sps:$4 sm:$0xff]  }
  0xb0   : > { %v2055_v11 = vld [vmem:[#allocation8 + $0x48] ss:$16 sps:$4 sm:$0xff]   ;;  %v2056_v12 = vld [vmem:[#allocation8 + $0x64] ss:$16 sps:$4 sm:$0xff]   ;;  %v2058_v13 = vld [vmem:[#allocation8 + $0x6c] ss:$16 sps:$4 sm:$0xff]  }
  0xb1   : > { %v2060_v14 = vld [vmem:[#allocation8 + $0x60] ss:$16 sps:$4 sm:$0xff]   ;;  %v2061_v15 = vld [vmem:[#allocation8 + $0x68] ss:$16 sps:$4 sm:$0xff]   ;;  %v2062_v16 = vld [vmem:[#allocation8 + $0x84] ss:$16 sps:$4 sm:$0xff]  }
  0xb2   : > { %846 = vmatpush1.bf16.msra.mxu0 %v2048_v6  ;;  %949 = vmatpush1.bf16.msra.mxu1 %v2049_v7  ;;  %v2064_v17 = vld [vmem:[#allocation8 + $0x8c] ss:$16 sps:$4 sm:$0xff]   ;;  %v2066_v18 = vld [vmem:[#allocation8 + $0x80] ss:$16 sps:$4 sm:$0xff]   ;;  %v2067_v19 = vld [vmem:[#allocation8 + $0x88] ss:$16 sps:$4 sm:$0xff]  }
  0xb3   : > { %847 = vmatprep.subr.bf16.mxu0 %v2050_v8  ;;  %950 = vmatprep.subr.bf16.mxu1 %v2052_v9  ;;  %v2068_v20 = vld [vmem:[#allocation8 + $0xa4] ss:$16 sps:$4 sm:$0xff]   ;;  %v2070_v21 = vld [vmem:[#allocation8 + $0xac] ss:$16 sps:$4 sm:$0xff]   ;;  %v2072_v22 = vld [vmem:[#allocation8 + $0xa0] ss:$16 sps:$4 sm:$0xff]  }
  0xb4   : > { %v2073_v23 = vld [vmem:[#allocation8 + $0xa8] ss:$16 sps:$4 sm:$0xff]   ;;  %v2074_v24 = vld [vmem:[#allocation8 + $0xc4] ss:$16 sps:$4 sm:$0xff]   ;;  %v2076_v25 = vld [vmem:[#allocation8 + $0xcc] ss:$16 sps:$4 sm:$0xff]  }
  0xb5   : > { %v2078_v26 = vld [vmem:[#allocation8 + $0xc0] ss:$16 sps:$4 sm:$0xff]   ;;  %v2079_v27 = vld [vmem:[#allocation8 + $0xc8] ss:$16 sps:$4 sm:$0xff]   ;;  %v2080_v28 = vld [vmem:[#allocation8 + $0xe4] ss:$16 sps:$4 sm:$0xff]  }
  0xb6   : > { %848 = vmatpush1.bf16.msra.mxu0 %v2054_v10  ;;  %951 = vmatpush1.bf16.msra.mxu1 %v2055_v11  ;;  %v2082_v29 = vld [vmem:[#allocation8 + $0xec] ss:$16 sps:$4 sm:$0xff]   ;;  %v2084_v30 = vld [vmem:[#allocation8 + $0xe0] ss:$16 sps:$4 sm:$0xff]   ;;  %v2085_v31 = vld [vmem:[#allocation8 + $0xe8] ss:$16 sps:$4 sm:$0xff]  }
  0xb7   : > { %849 = vmatprep.subr.bf16.mxu0 %v2056_v12  ;;  %952 = vmatprep.subr.bf16.mxu1 %v2058_v13  ;;  %v2086_v32 = vld [vmem:[#allocation8 + $0x104] ss:$16 sps:$4 sm:$0xff]   ;;  %v2088_v33 = vld [vmem:[#allocation8 + $0x10c] ss:$16 sps:$4 sm:$0xff]   ;;  %v2090_v34 = vld [vmem:[#allocation8 + $0x100] ss:$16 sps:$4 sm:$0xff]  }
  0xb8   : > { %v2091_v35 = vld [vmem:[#allocation8 + $0x108] ss:$16 sps:$4 sm:$0xff]   ;;  %v2092_v36 = vld [vmem:[#allocation8 + $0x124] ss:$16 sps:$4 sm:$0xff]   ;;  %v2094_v37 = vld [vmem:[#allocation8 + $0x12c] ss:$16 sps:$4 sm:$0xff]  }
  0xb9   : > { %v2096_v38 = vld [vmem:[#allocation8 + $0x120] ss:$16 sps:$4 sm:$0xff]   ;;  %v2097_v39 = vld [vmem:[#allocation8 + $0x128] ss:$16 sps:$4 sm:$0xff]   ;;  %v2098_v40 = vld [vmem:[#allocation8 + $0x144] ss:$16 sps:$4 sm:$0xff]  }
  0xba   : > { %850 = vmatpush1.bf16.msra.mxu0 %v2060_v14  ;;  %953 = vmatpush1.bf16.msra.mxu1 %v2061_v15  ;;  %v2100_v41 = vld [vmem:[#allocation8 + $0x14c] ss:$16 sps:$4 sm:$0xff]   ;;  %v2102_v42 = vld [vmem:[#allocation8 + $0x140] ss:$16 sps:$4 sm:$0xff]   ;;  %v2103_v43 = vld [vmem:[#allocation8 + $0x148] ss:$16 sps:$4 sm:$0xff]  }
  0xbb   : > { %851 = vmatprep.subr.bf16.mxu0 %v2062_v16  ;;  %954 = vmatprep.subr.bf16.mxu1 %v2064_v17  ;;  %v2104_v44 = vld [vmem:[#allocation8 + $0x164] ss:$16 sps:$4 sm:$0xff]   ;;  %v2106_v45 = vld [vmem:[#allocation8 + $0x16c] ss:$16 sps:$4 sm:$0xff]   ;;  %v2108_v48 = vld [vmem:[#allocation8 + $0x160] ss:$16 sps:$4 sm:$0xff]  }
  0xbc   : > { %v395_v46 = vld [vmem:[%s2639_s30] sm:$0xff]  ;;  %v396_v47 = vld [vmem:[%s2639_s30 + $0x8] sm:$0xff]  ;;  %v397_v5 = vld [vmem:[%s2639_s30 + $0x10] sm:$0xff]  ;;  %s2756_s27 = scalar_lea.vmem [#allocation11], %s2627_s20  ;;  %s1589_s14 = scalar_lea.sflag [#allocation5], %s2624_s19 }
  0xbd   : > { %v2109_v49 = vld [vmem:[#allocation8 + $0x168] ss:$16 sps:$4 sm:$0xff]   ;;  %v409_v50 = vpack.c.bf16 %v396_v47, %v395_v46  ;;  %v2110_v51 = vld [vmem:[#allocation8 + $0x184] ss:$16 sps:$4 sm:$0xff]   ;;  %v2112_v52 = vld [vmem:[#allocation8 + $0x18c] ss:$16 sps:$4 sm:$0xff]  }
  0xbe   : > { %852 = vmatpush1.bf16.msra.mxu0 %v2066_v18  ;;  %955 = vmatpush1.bf16.msra.mxu1 %v2067_v19  ;;  %v2114_v53 = vld [vmem:[#allocation8 + $0x180] ss:$16 sps:$4 sm:$0xff]   ;;  %v2115_v54 = vld [vmem:[#allocation8 + $0x188] ss:$16 sps:$4 sm:$0xff]   ;;  %v2116_v55 = vld [vmem:[#allocation8 + $0x1a4] ss:$16 sps:$4 sm:$0xff]  }
  0xbf   : > { %853 = vmatprep.subr.bf16.mxu0 %v2068_v20  ;;  %956 = vmatprep.subr.bf16.mxu1 %v2070_v21  ;;  %v2118_v56 = vld [vmem:[#allocation8 + $0x1ac] ss:$16 sps:$4 sm:$0xff]   ;;  %v2120_v57 = vld [vmem:[#allocation8 + $0x1a0] ss:$16 sps:$4 sm:$0xff]   ;;  %v2121_v58 = vld [vmem:[#allocation8 + $0x1a8] ss:$16 sps:$4 sm:$0xff]  }
  0xc0   : > { %875 = vmatprep.mubr.bf16.mxu0 %v409_v50  ;;  %978 = vmatprep.mubr.bf16.mxu1 %v409_v50  ;;  %v2122_v59 = vld [vmem:[#allocation8 + $0x1c4] ss:$16 sps:$4 sm:$0xff]   ;;  %v2124_v60 = vld [vmem:[#allocation8 + $0x1cc] ss:$16 sps:$4 sm:$0xff]   ;;  %v2126_v61 = vld [vmem:[#allocation8 + $0x1c0] ss:$16 sps:$4 sm:$0xff]  }
  0xc1   : > { %v2127_v62 = vld [vmem:[#allocation8 + $0x1c8] ss:$16 sps:$4 sm:$0xff]   ;;  %v2128_v63 = vld [vmem:[#allocation8 + $0x1e4] ss:$16 sps:$4 sm:$0xff]   ;;  %v2130_v0 = vld [vmem:[#allocation8 + $0x1ec] ss:$16 sps:$4 sm:$0xff]  }
  0xc2   : > { %854 = vmatpush1.bf16.msra.mxu0 %v2072_v22  ;;  %957 = vmatpush1.bf16.msra.mxu1 %v2073_v23  ;;  %v2132_v1 = vld [vmem:[#allocation8 + $0x1e0] ss:$16 sps:$4 sm:$0xff]   ;;  %v2133_v2 = vld [vmem:[#allocation8 + $0x1e8] ss:$16 sps:$4 sm:$0xff]   ;;  %p2875_p0 = scmp.ne.s32.totalorder %s2863_s9, 0 }
  0xc3   : > { %855 = vmatprep.subr.bf16.mxu0 %v2074_v24  ;;  %958 = vmatprep.subr.bf16.mxu1 %v2076_v25  ;;  %v367_v3 = vld [vmem:[%s2631_s16] sm:$0xff]  ;;  %v368_v4 = vld [vmem:[%s2631_s16 + $0x8] sm:$0xff]  ;;  %v398_v6 = vld [vmem:[%s2639_s30 + $0x18] sm:$0xff]  ;;  %s1596_s7 = smul.u32 (%p2875_p0), 14, %s2429_s25 }
  0xc4   : > { %v2134_v7 = vld [vmem:[#allocation9 + $0x40] sm:$0xff]   ;;  %v381_v9 = vpack.c.bf16 %v368_v4, %v367_v3  ;;  %v410_v11 = vpack.c.bf16 %v398_v6, %v397_v5  ;;  %v2138_v13 = vld [vmem:[#allocation9 + $0x48] sm:$0xff]   ;;  %v2142_v21 = vld [vmem:[#allocation9 + $0x50] sm:$0xff]  }
  0xc5   : > { %v2136_v8 = vld [vmem:[#allocation9 + $0xc0] sm:$0xff]   ;;  %v370_v15 = vld [vmem:[%s2631_s16 + $0x18] sm:$0xff]  ;;  %v400_v18 = vld [vmem:[%s2639_s30 + $0x28] sm:$0xff]  ;;  %s1597_s13 = ssub.s32 (%p2875_p0), 25, %s1596_s7 }
  0xc6   : > { %856 = vmatpush1.bf16.msra.mxu0 %v2078_v26  ;;  %959 = vmatpush1.bf16.msra.mxu1 %v2079_v27  ;;  %v2135_v10 = vld [vmem:[#allocation9] sm:$0xff]   ;;  %v2140_v16 = vld [vmem:[#allocation9 + $0xc8] sm:$0xff]   ;;  %v2144_v22 = vld [vmem:[#allocation9 + $0xd0] sm:$0xff]   ;;  %p1598_p12 = scmp.lt.s32.totalorder (%p2875_p0), %s1597_s13, 14 }
  0xc7   : > { %857 = vmatprep.subr.bf16.mxu0 %v2080_v28  ;;  %960 = vmatprep.subr.bf16.mxu1 %v2082_v29  ;;  %v2137_v12 = vld [vmem:[#allocation9 + $0x80] sm:$0xff]   ;;  %v2139_v19 = vld [vmem:[#allocation9 + $0x8] sm:$0xff]   ;;  %v2143_v24 = vld [vmem:[#allocation9 + $0x10] sm:$0xff]  }
  0xc8   : > { %v369_v14 = vld [vmem:[%s2631_s16 + $0x10] sm:$0xff]  ;;  %v399_v17 = vld [vmem:[%s2639_s30 + $0x20] sm:$0xff]  ;;  %v2141_v20 = vld [vmem:[#allocation9 + $0x88] sm:$0xff]  }
  0xc9   : > { %v382_v23 = vpack.c.bf16 %v370_v15, %v369_v14  ;;  %v411_v25 = vpack.c.bf16 %v400_v18, %v399_v17  ;;  %v2145_v26 = vld [vmem:[#allocation9 + $0x90] sm:$0xff]   ;;  %v2146_v27 = vld [vmem:[#allocation9 + $0x58] sm:$0xff]   ;;  %v2155_v47 = vld [vmem:[#allocation9 + $0x28] sm:$0xff]  }
  0xca   : > { %858 = vmatpush1.bf16.msra.mxu0 %v2084_v30  ;;  %961 = vmatpush1.bf16.msra.mxu1 %v2085_v31  ;;  %v371_v28 = vld [vmem:[%s2631_s16 + $0x20] sm:$0xff]  ;;  %v372_v29 = vld [vmem:[%s2631_s16 + $0x28] sm:$0xff]  ;;  %v401_v31 = vld [vmem:[%s2639_s30 + $0x30] sm:$0xff] }
  0xcb   : > { %859 = vmatprep.subr.bf16.mxu0 %v2086_v32  ;;  %962 = vmatprep.subr.bf16.mxu1 %v2088_v33  ;;  %v2148_v30 = vld [vmem:[#allocation9 + $0xd8] sm:$0xff]   ;;  %v2160_v50 = vld [vmem:[#allocation9 + $0xf0] sm:$0xff]   ;;  %v501_v14 = vld [vmem:[%s2850_s3] sm:$0xf] }
  0xcc   : > { %v402_v32 = vld [vmem:[%s2639_s30 + $0x38] sm:$0xff]  ;;  %v404_v46 = vld [vmem:[%s2639_s30 + $0x48] sm:$0xff]  ;;  %v379_v3 = vld [vmem:[%s2631_s16 + $0x60] sm:$0xff] }
  0xcd   : > { %v2147_v33 = vld [vmem:[#allocation9 + $0x18] sm:$0xff]  }
  0xce   : > { %860 = vmatpush1.bf16.msra.mxu0 %v2090_v34  ;;  %963 = vmatpush1.bf16.msra.mxu1 %v2091_v35  ;;  %v2149_v34 = vld [vmem:[#allocation9 + $0x98] sm:$0xff]   ;;  %v2150_v35 = vld [vmem:[#allocation9 + $0x60] sm:$0xff]  }
  0xcf   : > { %861 = vmatprep.subr.bf16.mxu0 %v2092_v36  ;;  %964 = vmatprep.subr.bf16.mxu1 %v2094_v37  ;;  %v2152_v36 = vld [vmem:[#allocation9 + $0xe0] sm:$0xff]   ;;  %v383_v37 = vpack.c.bf16 %v372_v29, %v371_v28  ;;  %v380_v4 = vld [vmem:[%s2631_s16 + $0x68] sm:$0xff] }
  0xd0   : > { %v387_v5 = vpack.c.bf16 %v380_v4, %v379_v3  ;;  %v2162_v6 = vld [vmem:[#allocation9 + $0x78] sm:$0xff]  }
  0xd2   : > { %862 = vmatpush1.bf16.msra.mxu0 %v2096_v38  ;;  %965 = vmatpush1.bf16.msra.mxu1 %v2097_v39  ;;  %v2151_v38 = vld [vmem:[#allocation9 + $0x20] sm:$0xff]  }
  0xd3   : > { %863 = vmatprep.subr.bf16.mxu0 %v2098_v40  ;;  %966 = vmatprep.subr.bf16.mxu1 %v2100_v41  ;;  %v2153_v39 = vld [vmem:[#allocation9 + $0xa0] sm:$0xff]   ;;  %v412_v40 = vpack.c.bf16 %v402_v32, %v401_v31  ;;  %v2154_v41 = vld [vmem:[#allocation9 + $0x68] sm:$0xff]  }
  0xd6   : > { %864 = vmatpush1.bf16.msra.mxu0 %v2102_v42  ;;  %967 = vmatpush1.bf16.msra.mxu1 %v2103_v43  ;;  %v2156_v42 = vld [vmem:[#allocation9 + $0xe8] sm:$0xff]   ;;  %v373_v43 = vld [vmem:[%s2631_s16 + $0x30] sm:$0xff] }
  0xd7   : > { %865 = vmatprep.subr.bf16.mxu0 %v2104_v44  ;;  %968 = vmatprep.subr.bf16.mxu1 %v2106_v45  ;;  %v374_v44 = vld [vmem:[%s2631_s16 + $0x38] sm:$0xff]  ;;  %v403_v45 = vld [vmem:[%s2639_s30 + $0x40] sm:$0xff] }
  0xda   : > { %866 = vmatpush1.bf16.msra.mxu0 %v2108_v48  ;;  %969 = vmatpush1.bf16.msra.mxu1 %v2109_v49  ;;  %v2157_v48 = vld [vmem:[#allocation9 + $0xa8] sm:$0xff]   ;;  %v2158_v49 = vld [vmem:[#allocation9 + $0x70] sm:$0xff]  }
  0xdb   : > { %867 = vmatprep.subr.bf16.mxu0 %v2110_v51  ;;  %970 = vmatprep.subr.bf16.mxu1 %v2112_v52  ;;  %v384_v51 = vpack.c.bf16 %v374_v44, %v373_v43  ;;  %v413_v52 = vpack.c.bf16 %v404_v46, %v403_v45 }
  0xde   : > { %868 = vmatpush1.bf16.msra.mxu0 %v2114_v53  ;;  %971 = vmatpush1.bf16.msra.mxu1 %v2115_v54  ;;  %v2159_v53 = vld [vmem:[#allocation9 + $0x30] sm:$0xff]  }
  0xdf   : > { %869 = vmatprep.subr.bf16.mxu0 %v2116_v55  ;;  %972 = vmatprep.subr.bf16.mxu1 %v2118_v56  ;;  %v2161_v54 = vld [vmem:[#allocation9 + $0xb0] sm:$0xff]   ;;  %v376_v56 = vld [vmem:[%s2631_s16 + $0x48] sm:$0xff] }
  0xe0   : > { %v375_v55 = vld [vmem:[%s2631_s16 + $0x40] sm:$0xff] }
  0xe2   : > { %870 = vmatpush1.bf16.msra.mxu0 %v2120_v57  ;;  %973 = vmatpush1.bf16.msra.mxu1 %v2121_v58  ;;  %v405_v57 = vld [vmem:[%s2639_s30 + $0x50] sm:$0xff]  ;;  %v406_v58 = vld [vmem:[%s2639_s30 + $0x58] sm:$0xff] }
  0xe3   : > { %871 = vmatprep.subr.bf16.mxu0 %v2122_v59  ;;  %974 = vmatprep.subr.bf16.mxu1 %v2124_v60  ;;  %v385_v59 = vpack.c.bf16 %v376_v56, %v375_v55  ;;  %v414_v60 = vpack.c.bf16 %v406_v58, %v405_v57 }
  0xe6   : > { %872 = vmatpush1.bf16.msra.mxu0 %v2126_v61  ;;  %975 = vmatpush1.bf16.msra.mxu1 %v2127_v62  ;;  %v377_v61 = vld [vmem:[%s2631_s16 + $0x50] sm:$0xff]  ;;  %v378_v62 = vld [vmem:[%s2631_s16 + $0x58] sm:$0xff] }
  0xe7   : > { %873 = vmatprep.subr.bf16.mxu0 %v2128_v63  ;;  %976 = vmatprep.subr.bf16.mxu1 %v2130_v0  ;;  %v407_v63 = vld [vmem:[%s2639_s30 + $0x60] sm:$0xff]  ;;  %v408_v0 = vld [vmem:[%s2639_s30 + $0x68] sm:$0xff] }
  0xea   : > { %874 = vmatpush1.bf16.msra.mxu0 %v2132_v1  ;;  %977 = vmatpush1.bf16.msra.mxu1 %v2133_v2  ;;  %v386_v1 = vpack.c.bf16 %v378_v62, %v377_v61  ;;  %v415_v2 = vpack.c.bf16 %v408_v0, %v407_v63 }
  0xeb   : > { %1848 = vmatprep.subr.bf16.mxu0 %v2134_v7  ;;  %1906 = vmatprep.subr.bf16.mxu1 %v2136_v8  ;;  %v2164_v7 = vld [vmem:[#allocation9 + $0xf8] sm:$0xff]  }
  0xec   : > { %v2163_v8 = vld [vmem:[#allocation9 + $0x38] sm:$0xff]  }
  0xed   : > { %876 = vmatmul.mubr.bf16.vlgmr.msra.gmra.mrb[0].mxu0 %v381_v9  ;;  %979 = vmatmul.mubr.bf16.vlgmr.msra.gmra.mrb[0].mxu1 %v381_v9  ;;  %v2165_v9 = vld [vmem:[#allocation9 + $0xb8] sm:$0xff]  }
  0xee   : > { %885 = vmatprep.mubr.bf16.mxu0 %v410_v11  ;;  %988 = vmatprep.mubr.bf16.mxu1 %v410_v11 }
  0xef   : > { %1849 = vmatpush3.bf16.msra.mxu0 %v2135_v10  ;;  %1907 = vmatpush3.bf16.msra.mxu1 %v2137_v12  ;;  %v503_v10 = vlaneseq }
  0xf0   : > { %1850 = vmatprep.subr.bf16.mxu0 %v2138_v13  ;;  %1908 = vmatprep.subr.bf16.mxu1 %v2140_v16 }
  0xf1   : > { %v504_v11 = vshrl.u32 %v503_v10, 7 }
  0xf3   : > { %1851 = vmatpush3.bf16.msra.mxu0 %v2139_v19  ;;  %1909 = vmatpush3.bf16.msra.mxu1 %v2141_v20  ;;  %v505_v12 = vsub.s32 0, %v504_v11  ;;  %v513_v13 = vsub.s32 2, %v504_v11  ;;  %v509_v15 = vsub.s32 1, %v504_v11  ;;  %v517_v16 = vsub.s32 3, %v504_v11 }
  0xf4   : > { %1852 = vmatprep.subr.bf16.mxu0 %v2142_v21  ;;  %1910 = vmatprep.subr.bf16.mxu1 %v2144_v22 }
  0xf5   : > { %886 = vmatmul.mubr.bf16.gmra.mrb[4].mxu0 %v382_v23  ;;  %989 = vmatmul.mubr.bf16.gmra.mrb[4].mxu1 %v382_v23  ;;  %v2684_v17 = vrot.slane %v501_v14, %v505_v12  ;;  %v2686_v18 = vrot.slane %v501_v14, %v513_v13  ;;  %v2688_v19 = vrot.slane %v501_v14, %v509_v15 }
  0xf6   : > { %895 = vmatprep.mubr.bf16.mxu0 %v411_v25  ;;  %998 = vmatprep.mubr.bf16.mxu1 %v411_v25  ;;  %v2690_v20 = vrot.slane %v501_v14, %v517_v16 }
  0xf7   : > { %1853 = vmatpush3.bf16.msra.mxu0 %v2143_v24  ;;  %1911 = vmatpush3.bf16.msra.mxu1 %v2145_v26 }
  0xf8   : > { %1854 = vmatprep.subr.bf16.mxu0 %v2146_v27  ;;  %1912 = vmatprep.subr.bf16.mxu1 %v2148_v30 }
  0xfb   : > { %1855 = vmatpush3.bf16.msra.mxu0 %v2147_v33  ;;  %1913 = vmatpush3.bf16.msra.mxu1 %v2149_v34 }
  0xfc   : > { %1856 = vmatprep.subr.bf16.mxu0 %v2150_v35  ;;  %1914 = vmatprep.subr.bf16.mxu1 %v2152_v36 }
  0xfd   : > { %896 = vmatmul.mubr.bf16.gmra.mrb[8].mxu0 %v383_v37  ;;  %999 = vmatmul.mubr.bf16.gmra.mrb[8].mxu1 %v383_v37 }
  0xfe   : > { %905 = vmatprep.mubr.bf16.mxu0 %v412_v40  ;;  %1008 = vmatprep.mubr.bf16.mxu1 %v412_v40 }
  0xff   : > { %1857 = vmatpush3.bf16.msra.mxu0 %v2151_v38  ;;  %1915 = vmatpush3.bf16.msra.mxu1 %v2153_v39 }
 0x100   : > { %1858 = vmatprep.subr.bf16.mxu0 %v2154_v41  ;;  %1916 = vmatprep.subr.bf16.mxu1 %v2156_v42 }
 0x103   : > { %1859 = vmatpush3.bf16.msra.mxu0 %v2155_v47  ;;  %1917 = vmatpush3.bf16.msra.mxu1 %v2157_v48 }
 0x104   : > { %1860 = vmatprep.subr.bf16.mxu0 %v2158_v49  ;;  %1918 = vmatprep.subr.bf16.mxu1 %v2160_v50 }
 0x105   : > { %906 = vmatmul.mubr.bf16.gmra.mrb[12].mxu0 %v384_v51  ;;  %1009 = vmatmul.mubr.bf16.gmra.mrb[12].mxu1 %v384_v51 }
 0x106   : > { %915 = vmatprep.mubr.bf16.mxu0 %v413_v52  ;;  %1018 = vmatprep.mubr.bf16.mxu1 %v413_v52 }
 0x107   : > { %1861 = vmatpush3.bf16.msra.mxu0 %v2159_v53  ;;  %1919 = vmatpush3.bf16.msra.mxu1 %v2161_v54 }
 0x108   : > { %1862 = vmatprep.subr.bf16.mxu0 %v2162_v6  ;;  %1920 = vmatprep.subr.bf16.mxu1 %v2164_v7 }
 0x10b   : > { %1863 = vmatpush3.bf16.msra.mxu0 %v2163_v8  ;;  %1921 = vmatpush3.bf16.msra.mxu1 %v2165_v9 }
 0x10d   : > { %916 = vmatmul.mubr.bf16.gmra.mrb[16].mxu0 %v385_v59  ;;  %1019 = vmatmul.mubr.bf16.gmra.mrb[16].mxu1 %v385_v59 }
 0x10e   : > { %925 = vmatprep.mubr.bf16.mxu0 %v414_v60  ;;  %1028 = vmatprep.mubr.bf16.mxu1 %v414_v60 }
 0x115   : > { %926 = vmatmul.mubr.bf16.gmra.mrb[20].mxu0 %v386_v1  ;;  %1029 = vmatmul.mubr.bf16.gmra.mrb[20].mxu1 %v386_v1 }
 0x116   : > { %935 = vmatprep.mubr.bf16.mxu0 %v415_v2  ;;  %1038 = vmatprep.mubr.bf16.mxu1 %v415_v2 }
 0x11d   : > { %936 = vmatmul.mubr.bf16.gmra.mrb[24].mxu0 %v387_v5  ;;  %1039 = vmatmul.mubr.bf16.gmra.mrb[24].mxu1 %v387_v5 }
 0x1c0   : > { %v877_v21 = vpop.f32.mrb[0].mxu0  ;;  %v980_v22 = vpop.f32.mrb[0].mxu1 }
 0x1c1   : > { %v878_v23 = vadd.f32 %v877_v21, %v2684_v17  ;;  %v981_v24 = vadd.f32 %v980_v22, %v2686_v18  ;;  %v879_v25 = vpop.f32.mrb[1].mxu0  ;;  %v982_v26 = vpop.f32.mrb[1].mxu1 }
 0x1c2   : > { %v880_v27 = vadd.f32 %v879_v25, %v2688_v19  ;;  %v983_v28 = vadd.f32 %v982_v26, %v2690_v20  ;;  %v881_v29 = vpop.f32.mrb[2].mxu0  ;;  %v984_v30 = vpop.f32.mrb[2].mxu1 }
 0x1c3   : > { %v1051_v31 = vmax.f32 %v981_v24, 0.0  ;;  %v882_v32 = vadd.f32 %v881_v29, %v2684_v17  ;;  %v985_v33 = vadd.f32 %v984_v30, %v2686_v18  ;;  %v883_v34 = vpop.f32.mrb[3].mxu0  ;;  %v986_v35 = vpop.f32.mrb[3].mxu1  ;;  %v1049_v39 = vmax.f32 %v878_v23, 0.0 }
 0x1c4   : > { %v1052_v36 = vmax.f32 %v983_v28, 0.0  ;;  %v884_v37 = vadd.f32 %v883_v34, %v2688_v19  ;;  %v987_v38 = vadd.f32 %v986_v35, %v2690_v20  ;;  %v1050_v42 = vmax.f32 %v880_v27, 0.0 }
 0x1c5   : > { %v1053_v40 = vmax.f32 %v882_v32, 0.0  ;;  %v1055_v41 = vmax.f32 %v985_v33, 0.0 }
 0x1c6   : > { %v1054_v43 = vmax.f32 %v884_v37, 0.0  ;;  %v1056_v44 = vmax.f32 %v987_v38, 0.0 }
 0x1c7   : > { %v1105_v45 = vpack.c.bf16 %v1053_v40, %v1049_v39  ;;  %v1107_v46 = vpack.c.bf16 %v1055_v41, %v1051_v31 }
 0x1c8   : > { %v1106_v47 = vpack.c.bf16 %v1054_v43, %v1050_v42  ;;  %v1108_v48 = vpack.c.bf16 %v1056_v44, %v1052_v36  ;;  %v887_v49 = vpop.f32.mrb[4].mxu0  ;;  %v990_v50 = vpop.f32.mrb[4].mxu1 }
 0x1c9   : > { %v888_v51 = vadd.f32 %v887_v49, %v2684_v17  ;;  %v991_v52 = vadd.f32 %v990_v50, %v2686_v18  ;;  %v889_v53 = vpop.f32.mrb[5].mxu0  ;;  %v992_v54 = vpop.f32.mrb[5].mxu1 }
 0x1ca   : > { %v890_v55 = vadd.f32 %v889_v53, %v2688_v19  ;;  %v993_v56 = vadd.f32 %v992_v54, %v2690_v20  ;;  %v891_v57 = vpop.f32.mrb[6].mxu0  ;;  %v994_v58 = vpop.f32.mrb[6].mxu1  ;;  %1428 = vmatprep.mubr.bf16.mxu0 %v1106_v47  ;;  %1517 = vmatprep.mubr.bf16.mxu1 %v1108_v48 }
 0x1cb   : > { %v1059_v59 = vmax.f32 %v991_v52, 0.0  ;;  %v892_v60 = vadd.f32 %v891_v57, %v2684_v17  ;;  %v995_v61 = vadd.f32 %v994_v58, %v2686_v18  ;;  %v893_v62 = vpop.f32.mrb[7].mxu0  ;;  %v996_v63 = vpop.f32.mrb[7].mxu1  ;;  %1429 = vmatmul.mubr.bf16.vlgmr.msra.gmra.mrb[28].mxu0 %v1105_v45  ;;  %1518 = vmatmul.mubr.bf16.vlgmr.msra.gmra.mrb[28].mxu1 %v1107_v46  ;;  %v1057_v3 = vmax.f32 %v888_v51, 0.0 }
 0x1cc   : > { %v1060_v0 = vmax.f32 %v993_v56, 0.0  ;;  %v894_v1 = vadd.f32 %v893_v62, %v2688_v19  ;;  %v997_v2 = vadd.f32 %v996_v63, %v2690_v20  ;;  %v1058_v6 = vmax.f32 %v890_v55, 0.0 }
 0x1cd   : > { %v1061_v4 = vmax.f32 %v892_v60, 0.0  ;;  %v1063_v5 = vmax.f32 %v995_v61, 0.0 }
 0x1ce   : > { %v1062_v7 = vmax.f32 %v894_v1, 0.0  ;;  %v1064_v8 = vmax.f32 %v997_v2, 0.0 }
 0x1cf   : > { %v1109_v9 = vpack.c.bf16 %v1061_v4, %v1057_v3  ;;  %v1111_v10 = vpack.c.bf16 %v1063_v5, %v1059_v59 }
 0x1d0   : > { %v1110_v11 = vpack.c.bf16 %v1062_v7, %v1058_v6  ;;  %v1112_v12 = vpack.c.bf16 %v1064_v8, %v1060_v0  ;;  %v897_v13 = vpop.f32.mrb[8].mxu0  ;;  %v1000_v14 = vpop.f32.mrb[8].mxu1 }
 0x1d1   : > { %v898_v15 = vadd.f32 %v897_v13, %v2684_v17  ;;  %v1001_v16 = vadd.f32 %v1000_v14, %v2686_v18  ;;  %v899_v21 = vpop.f32.mrb[9].mxu0  ;;  %v1002_v22 = vpop.f32.mrb[9].mxu1 }
 0x1d2   : > { %v900_v23 = vadd.f32 %v899_v21, %v2688_v19  ;;  %v1003_v24 = vadd.f32 %v1002_v22, %v2690_v20  ;;  %v901_v25 = vpop.f32.mrb[10].mxu0  ;;  %v1004_v26 = vpop.f32.mrb[10].mxu1  ;;  %1436 = vmatprep.mubr.bf16.mxu0 %v1110_v11  ;;  %1525 = vmatprep.mubr.bf16.mxu1 %v1112_v12 }
 0x1d3   : > { %v1067_v27 = vmax.f32 %v1001_v16, 0.0  ;;  %v902_v28 = vadd.f32 %v901_v25, %v2684_v17  ;;  %v1005_v29 = vadd.f32 %v1004_v26, %v2686_v18  ;;  %v903_v30 = vpop.f32.mrb[11].mxu0  ;;  %v1006_v31 = vpop.f32.mrb[11].mxu1  ;;  %1437 = vmatmul.mubr.bf16.gmra.mrb[32].mxu0 %v1109_v9  ;;  %1526 = vmatmul.mubr.bf16.gmra.mrb[32].mxu1 %v1111_v10  ;;  %v1065_v35 = vmax.f32 %v898_v15, 0.0 }
 0x1d4   : > { %v1068_v32 = vmax.f32 %v1003_v24, 0.0  ;;  %v904_v33 = vadd.f32 %v903_v30, %v2688_v19  ;;  %v1007_v34 = vadd.f32 %v1006_v31, %v2690_v20  ;;  %v1066_v38 = vmax.f32 %v900_v23, 0.0 }
 0x1d5   : > { %v1069_v36 = vmax.f32 %v902_v28, 0.0  ;;  %v1071_v37 = vmax.f32 %v1005_v29, 0.0 }
 0x1d6   : > { %v1070_v39 = vmax.f32 %v904_v33, 0.0  ;;  %v1072_v40 = vmax.f32 %v1007_v34, 0.0 }
 0x1d7   : > { %v1113_v41 = vpack.c.bf16 %v1069_v36, %v1065_v35  ;;  %v1115_v42 = vpack.c.bf16 %v1071_v37, %v1067_v27 }
 0x1d8   : > { %v1114_v43 = vpack.c.bf16 %v1070_v39, %v1066_v38  ;;  %v1116_v44 = vpack.c.bf16 %v1072_v40, %v1068_v32  ;;  %v907_v45 = vpop.f32.mrb[12].mxu0  ;;  %v1010_v46 = vpop.f32.mrb[12].mxu1 }
 0x1d9   : > { %v908_v47 = vadd.f32 %v907_v45, %v2684_v17  ;;  %v1011_v48 = vadd.f32 %v1010_v46, %v2686_v18  ;;  %v909_v49 = vpop.f32.mrb[13].mxu0  ;;  %v1012_v50 = vpop.f32.mrb[13].mxu1 }
 0x1da   : > { %v910_v51 = vadd.f32 %v909_v49, %v2688_v19  ;;  %v1013_v52 = vadd.f32 %v1012_v50, %v2690_v20  ;;  %v911_v53 = vpop.f32.mrb[14].mxu0  ;;  %v1014_v54 = vpop.f32.mrb[14].mxu1  ;;  %1444 = vmatprep.mubr.bf16.mxu0 %v1114_v43  ;;  %1533 = vmatprep.mubr.bf16.mxu1 %v1116_v44 }
 0x1db   : > { %v1075_v55 = vmax.f32 %v1011_v48, 0.0  ;;  %v912_v56 = vadd.f32 %v911_v53, %v2684_v17  ;;  %v1015_v57 = vadd.f32 %v1014_v54, %v2686_v18  ;;  %v913_v58 = vpop.f32.mrb[15].mxu0  ;;  %v1016_v59 = vpop.f32.mrb[15].mxu1  ;;  %1445 = vmatmul.mubr.bf16.gmra.mrb[36].mxu0 %v1113_v41  ;;  %1534 = vmatmul.mubr.bf16.gmra.mrb[36].mxu1 %v1115_v42  ;;  %v1073_v63 = vmax.f32 %v908_v47, 0.0 }
 0x1dc   : > { %v1076_v60 = vmax.f32 %v1013_v52, 0.0  ;;  %v914_v61 = vadd.f32 %v913_v58, %v2688_v19  ;;  %v1017_v62 = vadd.f32 %v1016_v59, %v2690_v20  ;;  %v1074_v2 = vmax.f32 %v910_v51, 0.0 }
 0x1dd   : > { %v1077_v0 = vmax.f32 %v912_v56, 0.0  ;;  %v1079_v1 = vmax.f32 %v1015_v57, 0.0 }
 0x1de   : > { %v1078_v3 = vmax.f32 %v914_v61, 0.0  ;;  %v1080_v4 = vmax.f32 %v1017_v62, 0.0 }
 0x1df   : > { %v1117_v5 = vpack.c.bf16 %v1077_v0, %v1073_v63  ;;  %v1119_v6 = vpack.c.bf16 %v1079_v1, %v1075_v55 }
 0x1e0   : > { %v1118_v7 = vpack.c.bf16 %v1078_v3, %v1074_v2  ;;  %v1120_v8 = vpack.c.bf16 %v1080_v4, %v1076_v60  ;;  %v917_v9 = vpop.f32.mrb[16].mxu0  ;;  %v1020_v10 = vpop.f32.mrb[16].mxu1 }
 0x1e1   : > { %v918_v11 = vadd.f32 %v917_v9, %v2684_v17  ;;  %v1021_v12 = vadd.f32 %v1020_v10, %v2686_v18  ;;  %v919_v13 = vpop.f32.mrb[17].mxu0  ;;  %v1022_v14 = vpop.f32.mrb[17].mxu1 }
 0x1e2   : > { %v920_v15 = vadd.f32 %v919_v13, %v2688_v19  ;;  %v1023_v16 = vadd.f32 %v1022_v14, %v2690_v20  ;;  %v921_v21 = vpop.f32.mrb[18].mxu0  ;;  %v1024_v22 = vpop.f32.mrb[18].mxu1  ;;  %1452 = vmatprep.mubr.bf16.mxu0 %v1118_v7  ;;  %1541 = vmatprep.mubr.bf16.mxu1 %v1120_v8 }
 0x1e3   : > { %v1083_v23 = vmax.f32 %v1021_v12, 0.0  ;;  %v922_v24 = vadd.f32 %v921_v21, %v2684_v17  ;;  %v1025_v25 = vadd.f32 %v1024_v22, %v2686_v18  ;;  %v923_v26 = vpop.f32.mrb[19].mxu0  ;;  %v1026_v27 = vpop.f32.mrb[19].mxu1  ;;  %1453 = vmatmul.mubr.bf16.gmra.mrb[40].mxu0 %v1117_v5  ;;  %1542 = vmatmul.mubr.bf16.gmra.mrb[40].mxu1 %v1119_v6  ;;  %v1081_v31 = vmax.f32 %v918_v11, 0.0 }
 0x1e4   : > { %v1084_v28 = vmax.f32 %v1023_v16, 0.0  ;;  %v924_v29 = vadd.f32 %v923_v26, %v2688_v19  ;;  %v1027_v30 = vadd.f32 %v1026_v27, %v2690_v20  ;;  %v1082_v34 = vmax.f32 %v920_v15, 0.0 }
 0x1e5   : > { %v1085_v32 = vmax.f32 %v922_v24, 0.0  ;;  %v1087_v33 = vmax.f32 %v1025_v25, 0.0 }
 0x1e6   : > { %v1086_v35 = vmax.f32 %v924_v29, 0.0  ;;  %v1088_v36 = vmax.f32 %v1027_v30, 0.0 }
 0x1e7   : > { %v1121_v37 = vpack.c.bf16 %v1085_v32, %v1081_v31  ;;  %v1123_v38 = vpack.c.bf16 %v1087_v33, %v1083_v23 }
 0x1e8   : > { %v1122_v39 = vpack.c.bf16 %v1086_v35, %v1082_v34  ;;  %v1124_v40 = vpack.c.bf16 %v1088_v36, %v1084_v28  ;;  %v927_v41 = vpop.f32.mrb[20].mxu0  ;;  %v1030_v42 = vpop.f32.mrb[20].mxu1 }
 0x1e9   : > { %v928_v43 = vadd.f32 %v927_v41, %v2684_v17  ;;  %v1031_v44 = vadd.f32 %v1030_v42, %v2686_v18  ;;  %v929_v45 = vpop.f32.mrb[21].mxu0  ;;  %v1032_v46 = vpop.f32.mrb[21].mxu1 }
 0x1ea   : > { %v930_v47 = vadd.f32 %v929_v45, %v2688_v19  ;;  %v1033_v48 = vadd.f32 %v1032_v46, %v2690_v20  ;;  %v931_v49 = vpop.f32.mrb[22].mxu0  ;;  %v1034_v50 = vpop.f32.mrb[22].mxu1  ;;  %1460 = vmatprep.mubr.bf16.mxu0 %v1122_v39  ;;  %1549 = vmatprep.mubr.bf16.mxu1 %v1124_v40 }
 0x1eb   : > { %v1091_v51 = vmax.f32 %v1031_v44, 0.0  ;;  %v932_v52 = vadd.f32 %v931_v49, %v2684_v17  ;;  %v1035_v53 = vadd.f32 %v1034_v50, %v2686_v18  ;;  %v933_v54 = vpop.f32.mrb[23].mxu0  ;;  %v1036_v55 = vpop.f32.mrb[23].mxu1  ;;  %1461 = vmatmul.mubr.bf16.gmra.mrb[44].mxu0 %v1121_v37  ;;  %1550 = vmatmul.mubr.bf16.gmra.mrb[44].mxu1 %v1123_v38  ;;  %v1089_v59 = vmax.f32 %v928_v43, 0.0 }
 0x1ec   : > { %v1092_v56 = vmax.f32 %v1033_v48, 0.0  ;;  %v934_v57 = vadd.f32 %v933_v54, %v2688_v19  ;;  %v1037_v58 = vadd.f32 %v1036_v55, %v2690_v20  ;;  %v1090_v62 = vmax.f32 %v930_v47, 0.0 }
 0x1ed   : > { %v1093_v60 = vmax.f32 %v932_v52, 0.0  ;;  %v1095_v61 = vmax.f32 %v1035_v53, 0.0 }
 0x1ee   : > { %v1094_v63 = vmax.f32 %v934_v57, 0.0  ;;  %v1096_v0 = vmax.f32 %v1037_v58, 0.0 }
 0x1ef   : > { %v1125_v1 = vpack.c.bf16 %v1093_v60, %v1089_v59  ;;  %v1127_v2 = vpack.c.bf16 %v1095_v61, %v1091_v51 }
 0x1f0   : > { %v1126_v3 = vpack.c.bf16 %v1094_v63, %v1090_v62  ;;  %v1128_v4 = vpack.c.bf16 %v1096_v0, %v1092_v56  ;;  %v937_v5 = vpop.f32.mrb[24].mxu0  ;;  %v1040_v6 = vpop.f32.mrb[24].mxu1 }
 0x1f1   : > { %v938_v7 = vadd.f32 %v937_v5, %v2684_v17  ;;  %v1041_v8 = vadd.f32 %v1040_v6, %v2686_v18  ;;  %v939_v9 = vpop.f32.mrb[25].mxu0  ;;  %v1042_v10 = vpop.f32.mrb[25].mxu1 }
 0x1f2   : > { %v940_v11 = vadd.f32 %v939_v9, %v2688_v19  ;;  %v1043_v12 = vadd.f32 %v1042_v10, %v2690_v20  ;;  %v941_v13 = vpop.f32.mrb[26].mxu0  ;;  %v1044_v14 = vpop.f32.mrb[26].mxu1  ;;  %1468 = vmatprep.mubr.bf16.mxu0 %v1126_v3  ;;  %1557 = vmatprep.mubr.bf16.mxu1 %v1128_v4 }
 0x1f3   : > { %v1099_v15 = vmax.f32 %v1041_v8, 0.0  ;;  %v942_v16 = vadd.f32 %v941_v13, %v2684_v17  ;;  %v1045_v21 = vadd.f32 %v1044_v14, %v2686_v18  ;;  %v943_v22 = vpop.f32.mrb[27].mxu0  ;;  %v1046_v23 = vpop.f32.mrb[27].mxu1  ;;  %1469 = vmatmul.mubr.bf16.gmra.mrb[48].mxu0 %v1125_v1  ;;  %1558 = vmatmul.mubr.bf16.gmra.mrb[48].mxu1 %v1127_v2  ;;  %v1097_v27 = vmax.f32 %v938_v7, 0.0 }
 0x1f4   : > { %v1100_v24 = vmax.f32 %v1043_v12, 0.0  ;;  %v944_v25 = vadd.f32 %v943_v22, %v2688_v19  ;;  %v1047_v26 = vadd.f32 %v1046_v23, %v2690_v20  ;;  %v1098_v30 = vmax.f32 %v940_v11, 0.0  ;;  %v2751_v19 = vld [vmem:[%s2852_s5] ss:$0 sm:$0xff] }
 0x1f5   : > { %v1101_v28 = vmax.f32 %v942_v16, 0.0  ;;  %v1103_v29 = vmax.f32 %v1045_v21, 0.0 }
 0x1f6   : > { %v1102_v31 = vmax.f32 %v944_v25, 0.0  ;;  %v1104_v32 = vmax.f32 %v1047_v26, 0.0 }
 0x1f7   : > { %v1129_v33 = vpack.c.bf16 %v1101_v28, %v1097_v27  ;;  %v1131_v34 = vpack.c.bf16 %v1103_v29, %v1099_v15 }
 0x1f8   : > { %v1130_v17 = vpack.c.bf16 %v1102_v31, %v1098_v30  ;;  %v1132_v35 = vpack.c.bf16 %v1104_v32, %v1100_v24 }
 0x1fa   : > { %1476 = vmatprep.mubr.bf16.mxu0 %v1130_v17  ;;  %1565 = vmatprep.mubr.bf16.mxu1 %v1132_v35 }
 0x1fb   : > { %1477 = vmatmul.mubr.bf16.gmra.mrb[52].mxu0 %v1129_v33  ;;  %1566 = vmatmul.mubr.bf16.gmra.mrb[52].mxu1 %v1131_v34 }
 0x29e   : > { %v1864_v18 = vpop.f32.mrb[28].mxu0  ;;  %v1922_v36 = vpop.f32.mrb[28].mxu1 }
 0x29f   : > { %v1865_v20 = vpop.f32.mrb[29].mxu0  ;;  %v1923_v37 = vpop.f32.mrb[29].mxu1 }
 0x2a0   : > { %v1866_v38 = vadd.f32 %v1865_v20, %v1864_v18  ;;  %v1924_v39 = vadd.f32 %v1923_v37, %v1922_v36  ;;  %v1867_v40 = vpop.f32.mrb[30].mxu0  ;;  %v1925_v41 = vpop.f32.mrb[30].mxu1 }
 0x2a1   : > { %v1868_v42 = vpop.f32.mrb[31].mxu0  ;;  %v1926_v43 = vpop.f32.mrb[31].mxu1 }
 0x2a2   : > { %v1431_v44 = vadd.f32 %v1866_v38, %v2751_v19  ;;  %v1869_v45 = vadd.f32 %v1868_v42, %v1867_v40  ;;  %v1927_v46 = vadd.f32 %v1926_v43, %v1925_v41 }
 0x2a4   : > { %v1520_v47 = vadd.f32 %v1924_v39, %v1431_v44  ;;  %v1434_v48 = vadd.f32 %v1869_v45, %v2751_v19 }
 0x2a6   : > { %1574 = vst [vmem:[%s2756_s27] sm:$0xff] %v1520_v47  ;;  %v1523_v49 = vadd.f32 %v1927_v46, %v1434_v48  ;;  %v1870_v50 = vpop.f32.mrb[32].mxu0  ;;  %v1928_v51 = vpop.f32.mrb[32].mxu1 }
 0x2a7   : > { %v1871_v52 = vpop.f32.mrb[33].mxu0  ;;  %v1929_v53 = vpop.f32.mrb[33].mxu1 }
 0x2a8   : > { %1575 = vst [vmem:[%s2756_s27 + $0x8] sm:$0xff] %v1523_v49  ;;  %v1872_v54 = vadd.f32 %v1871_v52, %v1870_v50  ;;  %v1930_v55 = vadd.f32 %v1929_v53, %v1928_v51  ;;  %v1873_v56 = vpop.f32.mrb[34].mxu0  ;;  %v1931_v57 = vpop.f32.mrb[34].mxu1 }
 0x2a9   : > { %v1874_v58 = vpop.f32.mrb[35].mxu0  ;;  %v1932_v59 = vpop.f32.mrb[35].mxu1 }
 0x2aa   : > { %v1439_v60 = vadd.f32 %v1872_v54, %v2751_v19  ;;  %v1875_v61 = vadd.f32 %v1874_v58, %v1873_v56  ;;  %v1933_v62 = vadd.f32 %v1932_v59, %v1931_v57 }
 0x2ac   : > { %v1528_v63 = vadd.f32 %v1930_v55, %v1439_v60  ;;  %v1442_v0 = vadd.f32 %v1875_v61, %v2751_v19 }
 0x2ae   : > { %1576 = vst [vmem:[%s2756_s27 + $0x10] sm:$0xff] %v1528_v63  ;;  %v1531_v1 = vadd.f32 %v1933_v62, %v1442_v0  ;;  %v1876_v2 = vpop.f32.mrb[36].mxu0  ;;  %v1934_v3 = vpop.f32.mrb[36].mxu1 }
 0x2af   : > { %v1877_v4 = vpop.f32.mrb[37].mxu0  ;;  %v1935_v5 = vpop.f32.mrb[37].mxu1 }
 0x2b0   : > { %1577 = vst [vmem:[%s2756_s27 + $0x18] sm:$0xff] %v1531_v1  ;;  %v1878_v6 = vadd.f32 %v1877_v4, %v1876_v2  ;;  %v1936_v7 = vadd.f32 %v1935_v5, %v1934_v3  ;;  %v1879_v8 = vpop.f32.mrb[38].mxu0  ;;  %v1937_v9 = vpop.f32.mrb[38].mxu1 }
 0x2b1   : > { %v1880_v10 = vpop.f32.mrb[39].mxu0  ;;  %v1938_v11 = vpop.f32.mrb[39].mxu1 }
 0x2b2   : > { %v1447_v12 = vadd.f32 %v1878_v6, %v2751_v19  ;;  %v1881_v13 = vadd.f32 %v1880_v10, %v1879_v8  ;;  %v1939_v14 = vadd.f32 %v1938_v11, %v1937_v9 }
 0x2b4   : > { %v1536_v15 = vadd.f32 %v1936_v7, %v1447_v12  ;;  %v1450_v16 = vadd.f32 %v1881_v13, %v2751_v19 }
 0x2b6   : > { %1578 = vst [vmem:[%s2756_s27 + $0x20] sm:$0xff] %v1536_v15  ;;  %v1539_v21 = vadd.f32 %v1939_v14, %v1450_v16  ;;  %v1882_v22 = vpop.f32.mrb[40].mxu0  ;;  %v1940_v23 = vpop.f32.mrb[40].mxu1 }
 0x2b7   : > { %v1883_v24 = vpop.f32.mrb[41].mxu0  ;;  %v1941_v25 = vpop.f32.mrb[41].mxu1 }
 0x2b8   : > { %1579 = vst [vmem:[%s2756_s27 + $0x28] sm:$0xff] %v1539_v21  ;;  %v1884_v26 = vadd.f32 %v1883_v24, %v1882_v22  ;;  %v1942_v27 = vadd.f32 %v1941_v25, %v1940_v23  ;;  %v1885_v28 = vpop.f32.mrb[42].mxu0  ;;  %v1943_v29 = vpop.f32.mrb[42].mxu1 }
 0x2b9   : > { %v1886_v30 = vpop.f32.mrb[43].mxu0  ;;  %v1944_v31 = vpop.f32.mrb[43].mxu1 }
 0x2ba   : > { %v1455_v32 = vadd.f32 %v1884_v26, %v2751_v19  ;;  %v1887_v33 = vadd.f32 %v1886_v30, %v1885_v28  ;;  %v1945_v34 = vadd.f32 %v1944_v31, %v1943_v29 }
 0x2bc   : > { %v1544_v17 = vadd.f32 %v1942_v27, %v1455_v32  ;;  %v1458_v35 = vadd.f32 %v1887_v33, %v2751_v19 }
 0x2be   : > { %1580 = vst [vmem:[%s2756_s27 + $0x30] sm:$0xff] %v1544_v17  ;;  %v1547_v18 = vadd.f32 %v1945_v34, %v1458_v35  ;;  %v1888_v36 = vpop.f32.mrb[44].mxu0  ;;  %v1946_v20 = vpop.f32.mrb[44].mxu1 }
 0x2bf   : > { %v1889_v37 = vpop.f32.mrb[45].mxu0  ;;  %v1947_v38 = vpop.f32.mrb[45].mxu1 }
 0x2c0   : > { %1581 = vst [vmem:[%s2756_s27 + $0x38] sm:$0xff] %v1547_v18  ;;  %v1890_v39 = vadd.f32 %v1889_v37, %v1888_v36  ;;  %v1948_v40 = vadd.f32 %v1947_v38, %v1946_v20  ;;  %v1891_v41 = vpop.f32.mrb[46].mxu0  ;;  %v1949_v42 = vpop.f32.mrb[46].mxu1 }
 0x2c1   : > { %v1892_v43 = vpop.f32.mrb[47].mxu0  ;;  %v1950_v44 = vpop.f32.mrb[47].mxu1 }
 0x2c2   : > { %v1463_v45 = vadd.f32 %v1890_v39, %v2751_v19  ;;  %v1893_v46 = vadd.f32 %v1892_v43, %v1891_v41  ;;  %v1951_v47 = vadd.f32 %v1950_v44, %v1949_v42 }
 0x2c4   : > { %v1552_v48 = vadd.f32 %v1948_v40, %v1463_v45  ;;  %v1466_v49 = vadd.f32 %v1893_v46, %v2751_v19 }
 0x2c6   : > { %1582 = vst [vmem:[%s2756_s27 + $0x40] sm:$0xff] %v1552_v48  ;;  %v1555_v50 = vadd.f32 %v1951_v47, %v1466_v49  ;;  %v1894_v51 = vpop.f32.mrb[48].mxu0  ;;  %v1952_v52 = vpop.f32.mrb[48].mxu1 }
 0x2c7   : > { %v1895_v53 = vpop.f32.mrb[49].mxu0  ;;  %v1953_v54 = vpop.f32.mrb[49].mxu1 }
 0x2c8   : > { %1583 = vst [vmem:[%s2756_s27 + $0x48] sm:$0xff] %v1555_v50  ;;  %v1896_v55 = vadd.f32 %v1895_v53, %v1894_v51  ;;  %v1954_v56 = vadd.f32 %v1953_v54, %v1952_v52  ;;  %v1897_v57 = vpop.f32.mrb[50].mxu0  ;;  %v1955_v58 = vpop.f32.mrb[50].mxu1 }
 0x2c9   : > { %v1898_v59 = vpop.f32.mrb[51].mxu0  ;;  %v1956_v60 = vpop.f32.mrb[51].mxu1 }
 0x2ca   : > { %v1471_v61 = vadd.f32 %v1896_v55, %v2751_v19  ;;  %v1899_v62 = vadd.f32 %v1898_v59, %v1897_v57  ;;  %v1957_v63 = vadd.f32 %v1956_v60, %v1955_v58 }
 0x2cc   : > { %v1560_v0 = vadd.f32 %v1954_v56, %v1471_v61  ;;  %v1474_v1 = vadd.f32 %v1899_v62, %v2751_v19 }
 0x2ce   : > { %1584 = vst [vmem:[%s2756_s27 + $0x50] sm:$0xff] %v1560_v0  ;;  %v1563_v2 = vadd.f32 %v1957_v63, %v1474_v1  ;;  %v1900_v3 = vpop.f32.mrb[52].mxu0  ;;  %v1958_v4 = vpop.f32.mrb[52].mxu1 }
 0x2cf   : > { %v1901_v5 = vpop.f32.mrb[53].mxu0  ;;  %v1959_v6 = vpop.f32.mrb[53].mxu1 }
 0x2d0   : > { %1585 = vst [vmem:[%s2756_s27 + $0x58] sm:$0xff] %v1563_v2  ;;  %v1902_v7 = vadd.f32 %v1901_v5, %v1900_v3  ;;  %v1960_v8 = vadd.f32 %v1959_v6, %v1958_v4  ;;  %v1903_v9 = vpop.f32.mrb[54].mxu0  ;;  %v1961_v10 = vpop.f32.mrb[54].mxu1 }
 0x2d1   : > { %v1904_v11 = vpop.f32.mrb[55].mxu0  ;;  %v1962_v12 = vpop.f32.mrb[55].mxu1 }
 0x2d2   : > { %v1479_v13 = vadd.f32 %v1902_v7, %v2751_v19  ;;  %v1905_v14 = vadd.f32 %v1904_v11, %v1903_v9  ;;  %v1963_v15 = vadd.f32 %v1962_v12, %v1961_v10  ;;  %1595 = sbr.rel (!%p2875_p0) target bundleno = 757 (0x2f5), region = 64 }
 0x2d4   : > { %v1568_v16 = vadd.f32 %v1960_v8, %v1479_v13  ;;  %v1482_v21 = vadd.f32 %v1905_v14, %v2751_v19 }
 0x2d6   : > { %1586 = vst [vmem:[%s2756_s27 + $0x60] sm:$0xff] %v1568_v16  ;;  %v1571_v22 = vadd.f32 %v1963_v15, %v1482_v21 }
 0x2d8   : > { %1587 = vst [vmem:[%s2756_s27 + $0x68] sm:$0xff] %v1571_v22 }
 0x2d9   : > { %s2887_s13 = smov (!%p1598_p12, %s1597_s13), 14 }
 0x2da   : > { %s2788_s15 = sshll.u32 %s2887_s13, 7 }
 0x2db   : > { %s1602_s18 = ssub.s32 1792, %s2788_s15 }
 0x2dc   : > { %1603 = vsyncadd %s1589_s14, %s1602_s18  ;;  %p1839_p7 = scmp.ne.s32.totalorder %s2788_s15, 0  ;;  %s1847_s9 = smul.u32 1792, %s2429_s25 }
 0x2dd   : > { %s1608_s20 = sshll.u32 %s2756_s27, 4  ;;  %s2370_s30 = smov [#allocation11]   ;;  %s2801_s20 = int_to_ptr.vmem [resolvable:$true] %s1608_s20 }
 0x2de   : > { %s2799_s11 = scalar_lea.hbm %s2853_s6, %s1847_s9  ;;  %s2278_s12 = scalar_lea.vmem %s2801_s20, %s2788_s15 }
 0x2df   : > { %p2279_p8 = scmp.ne.s32.totalorder %s2801_s20, %s2278_s12  ;;  %s2282_s8 = sshll.u32 %s2370_s30, 4  ;;  %s2283_s8 = int_to_ptr.vmem [resolvable:$false] %s2282_s8 }
 0x2e0   : > { %s2284_s25 = scalar_lea.vmem %s2283_s8, 3584  ;;  %p2285_p3 = scmp.lt.s32.totalorder %s2801_s20, %s2283_s8 }
 0x2e1   : > { %p2280_p9 = pnand %p2279_p8, %p1839_p7  ;;  %p2286_p10 = scmp.lt.s32.totalorder %s2284_s25, %s2278_s12 }
 0x2e3   : > { %p2281_p1 = pneg %p2280_p9  ;;  %p2287_p5 = por %p2286_p10, %p2285_p3 }
 0x2e5   : > { %p2288_p2 = pnand %p2287_p5, %p2281_p1 }
 0x2e7   : > { %2291 = shalt.err (!%p2288_p2)
}
 0x2e8   : > { %s2292_s28 = scalar_lea.hbm %s2799_s11, %s2788_s15  ;;  %s2296_s27 = scalar_lea.hbm %s2853_s6, 3200 }
 0x2e9   : > { %p2293_p6 = scmp.ne.s32.totalorder %s2799_s11, %s2292_s28  ;;  %p2297_p0 = scmp.lt.u32.totalorder %s2799_s11, %s2853_s6 }
 0x2ea   : > { %p2298_p12 = scmp.lt.u32.totalorder %s2296_s27, %s2292_s28  ;;  %p2300_p9 = scmp.lt.u32.totalorder %s2292_s28, %s2799_s11 }
 0x2eb   : > { %p2294_p11 = pnand %p2293_p6, %p1839_p7 }
 0x2ec   : > { %p2299_p8 = por %p2298_p12, %p2297_p0 }
 0x2ed   : > { %p2295_p13 = pneg %p2294_p11 }
 0x2ee   : > { %p2301_p1 = por %p2300_p9, %p2299_p8 }
 0x2f0   : > { %p2302_p3 = pnand %p2301_p1, %p2295_p13 }
 0x2f2   : > { %2305 = shalt.err (!%p2302_p3)
}
 0x2f3   : > { %s2371_s18 = smov 128   ;;  %s2372_s9 = smov 8  }
 0x2f4   : > { %1614 = dma.vmem_to_hbm [thread:$0]  (%p1839_p7), %s2801_s20, %s2788_s15, %s2799_s11, %s1589_s14, %s2371_s18, %s2371_s18, %s2372_s9  }
 0x2f5 PF: > { %s1623_s26 = sand.u32 1, %s2344_s21   ;;  %p2876_p10 = scmp.ne.s32.totalorder %s2864_s10, 0 }
 0x2f6   : > { %s1624_s16 = scalar_lea.sflag [#allocation5], %s1623_s26 }
 0x2f7   : > { %p1986_p5 = pnand %p1727_p4, %p2876_p10 }
 0x2f9   : > { %2339 = dma.done.wait (!%p1986_p5), %s1624_s16, 1792  }
 0x2fa   : > { %2341 = vsyncadd (!%p1986_p5), %s1624_s16, 4294965504  ;;  %s2877_s24 = sld [smem:[#allocation17_spill]]  ;;  %s2878_s12 = sld [smem:[#allocation18_spill]] }
 0x2fb   : > { %s2879_s21 = smov %s2348_s22  ;;  %s2880_s22 = smov %s2352_s23 }
 0x300   : > { %p23_p2 = scmp.ge.s32.totalorder %s2877_s24, 4   ;;  %s2881_s23 = smov %s2878_s12 }
 0x302   :  { %25 = sbr.rel (!%p23_p2) target bundleno = 8 (0x8), region = 110 }
 0x309   :  { %1629 = vsyncpa [#allocation4], 1 }
 0x30a   :  { %1631 = vsyncpa [#allocation4 + $0x1], 1 }
 0x30b   :  { %1632 = vsyncpa [#allocation7], 1 }
 0x30c   :  { %1634 = vsyncpa [#allocation7 + $0x1], 1 }
 0x30d   :  { %1635 = vsyncpa [#allocation10], 1 }
 0x30e   :  { %1636 = vsyncpa [#allocation5], 1 }
 0x30f   :  { %1638 = vsyncpa [#allocation5 + $0x1], 1 }

</bundles_post_ra>
